<compile_context>
chip_gen: v5e
topology: v5e:2x2
jax: 0.10.0
libtpu: 0.0.40
codegen_flags: <defaults>
</compile_context>

<pallas_src>
import math

import jax
import jax.numpy as jnp
from jax.experimental import pallas as pl
from jax.experimental.pallas import tpu as pltpu

# ---- small synthetic XLNet config -------------------------------------------
VOCAB = 100
B = 2            # batch
S = 8            # sequence length
H = 32           # hidden size
NH = 4           # attention heads
DH = H // NH     # head dim
FF = 64          # feed-forward inner dim
LAYERS = 2
NUM_LABELS = 2
LN_EPS = 1e-12

BS = B * S       # flattened token count
G = B * NH       # (batch, head) groups for the batched attention einsums


# ---- kernel helpers ----------------------------------------------------------
def _layernorm(y, gamma, beta):
    mu = jnp.mean(y, axis=-1, keepdims=True)
    var = jnp.mean((y - mu) ** 2, axis=-1, keepdims=True)
    return (y - mu) * jax.lax.rsqrt(var + LN_EPS) * gamma + beta


# ---- single fused Pallas kernel ----------------------------------------------
def xlnet_fused_kernel(x_ref, negg_ref, sel_ref, onehot_ref,
                       wq_ref, wk_ref, wv_ref, wo_ref,
                       w1_ref, b1_ref, w2_ref, vec_ref,
                       wsum_ref, bsum_ref, wproj_ref, bproj_ref,
                       logits_ref, loss_ref):
    """Whole forward pass: LAYERS x (MHA + FFN) -> summary -> logits -> CE loss.

    The activation `x` (BS, H) is carried as a value across the statically
    unrolled layer loop, so it stays in vregs/VMEM for the entire forward.
    """
    x = x_ref[...]                                   # (BS, H)
    neg = negg_ref[...]                              # (G, S, S) additive key mask

    def bcast_w(w):                                  # (NH, a, b) -> (G, a, b)
        return jnp.broadcast_to(w[None], (B,) + w.shape).reshape((G,) + w.shape[1:])

    for l in range(LAYERS):                          # static unroll (LAYERS is tiny)
        # ---- multi-head self-attention: all heads & batch rows in batched einsums
        xg = jnp.broadcast_to(x.reshape(B, 1, S, H), (B, NH, S, H)).reshape(G, S, H)

        # head-major projections (1/sqrt(DH) already folded into Wq); XLNet q/k/v/o
        # projections have no bias terms.
        q = jnp.einsum("gsh,ghd->gsd", xg, bcast_w(wq_ref[l]),
                       preferred_element_type=jnp.float32)        # (G, S, DH)
        k = jnp.einsum("gsh,ghd->gsd", xg, bcast_w(wk_ref[l]),
                       preferred_element_type=jnp.float32)
        v = jnp.einsum("gsh,ghd->gsd", xg, bcast_w(wv_ref[l]),
                       preferred_element_type=jnp.float32)

        s = jnp.einsum("gqd,gkd->gqk", q, k,
                       preferred_element_type=jnp.float32) + neg  # (G, S, S)
        s = s - jnp.max(s, axis=-1, keepdims=True)
        p = jnp.exp(s)
        p = p * pl.reciprocal(jnp.sum(p, axis=-1, keepdims=True), approx=True)

        ctx = jnp.einsum("gqk,gkd->gqd", p, v,
                         preferred_element_type=jnp.float32)      # (G, S, DH)
        # output projection applied per head, then summed over heads
        oh = jnp.einsum("gqd,gdh->gqh", ctx, bcast_w(wo_ref[l]),
                        preferred_element_type=jnp.float32)       # (G, S, H)
        oh4 = oh.reshape(B, NH, S, H)
        o = oh4[:, 0]
        for n in range(1, NH):                       # NH static VPU adds (== head-sum)
            o = o + oh4[:, n]
        o = o.reshape(BS, H)

        vec = vec_ref[l]                             # (5, H): ln1_g, ln1_b, b2, ln2_g, ln2_b
        x = _layernorm(x + o, vec[0:1], vec[1:2])

        # ---- position-wise feed-forward (GELU)
        h1 = jnp.dot(x, w1_ref[l], preferred_element_type=jnp.float32) + b1_ref[l]
        h1 = jax.nn.gelu(h1)
        y = jnp.dot(h1, w2_ref[l], preferred_element_type=jnp.float32) + vec[2:3]
        x = _layernorm(x + y, vec[3:4], vec[4:5])

    # ---- SequenceSummary("last") via selector matmul, logits, CE loss ---------
    h_last = jnp.dot(sel_ref[...], x, preferred_element_type=jnp.float32)   # (B, H)
    t = jnp.tanh(jnp.dot(h_last, wsum_ref[...],
                         preferred_element_type=jnp.float32) + bsum_ref[...])
    logits = jnp.dot(t, wproj_ref[...],
                     preferred_element_type=jnp.float32) + bproj_ref[...]
    logits_ref[...] = logits                                                 # (B, NUM_LABELS)

    z = logits - jnp.max(logits, axis=-1, keepdims=True)
    logp = z - jnp.log(jnp.sum(jnp.exp(z), axis=-1, keepdims=True))
    nll = -jnp.sum(onehot_ref[...] * logp, axis=-1, keepdims=True)           # (B, 1)
    loss_ref[...] = jnp.sum(nll, keepdims=True) * (1.0 / B)                  # (1, 1)


# ---- pallas_call wrapper (single call, no grid, everything VMEM-resident) ----
def xlnet_forward_fused(x, neg_g, sel, onehot, p):
    vmem = lambda: pl.BlockSpec(memory_space=pltpu.MemorySpace.VMEM)
    logits, loss = pl.pallas_call(
        xlnet_fused_kernel,
        out_shape=(jax.ShapeDtypeStruct((B, NUM_LABELS), jnp.float32),
                   jax.ShapeDtypeStruct((1, 1), jnp.float32)),
        in_specs=[vmem() for _ in range(16)],
        out_specs=(vmem(), vmem()),
    )(x, neg_g, sel, onehot,
      p["wq_h"], p["wk_h"], p["wv_h"], p["wo_h"],
      p["w1"], p["b1"], p["w2"], p["vec"],
      p["w_sum"], p["b_sum"], p["w_proj"], p["b_proj"])
    return logits, loss


# ---- parameters (packed/stacked for the fused kernel) -------------------------
def init_params(key):
    keys = iter(jax.random.split(key, 12))

    def nrm(shape, scale=0.02):
        return jax.random.normal(next(keys), shape, jnp.float32) * scale

    def cols_head_major(w):          # (LAYERS, H, H) -> (LAYERS, NH, H, DH)
        return jnp.transpose(w.reshape(LAYERS, H, NH, DH), (0, 2, 1, 3))

    ones = jnp.ones((LAYERS, H), jnp.float32)
    zeros = jnp.zeros((LAYERS, H), jnp.float32)

    return {
        "word_emb": nrm((VOCAB, H)),
        "seg_emb": nrm((2, H)),
        "pos_emb": nrm((S, H)),
        # head-major attention weights stacked over layers; softmax 1/sqrt(DH)
        # folded into Wq so the kernel never multiplies by the scale.
        "wq_h": cols_head_major(nrm((LAYERS, H, H))) * (1.0 / math.sqrt(DH)),
        "wk_h": cols_head_major(nrm((LAYERS, H, H))),
        "wv_h": cols_head_major(nrm((LAYERS, H, H))),
        "wo_h": nrm((LAYERS, H, H)).reshape(LAYERS, NH, DH, H),
        "w1": nrm((LAYERS, H, FF)),
        "b1": jnp.zeros((LAYERS, 1, FF), jnp.float32),
        "w2": nrm((LAYERS, FF, H)),
        # packed per-layer vectors: rows = [ln1_g, ln1_b, ffn_b2, ln2_g, ln2_b]
        "vec": jnp.stack([ones, zeros, zeros, ones, zeros], axis=1),
        "w_sum": nrm((H, H)),
        "b_sum": jnp.zeros((1, H), jnp.float32),
        "w_proj": nrm((H, NUM_LABELS)),
        "b_proj": jnp.zeros((1, NUM_LABELS), jnp.float32),
    }


def mymodel_forward(params, input_data, label):
    input_ids = input_data["input_ids"]              # (B, S) int32
    token_type_ids = input_data["token_type_ids"]    # (B, S) int32
    attention_mask = input_data["attention_mask"].astype(jnp.float32)  # (B, S)

    # Embedding lookup + sum (gather stays in plain JAX).
    x = (params["word_emb"][input_ids]
         + params["seg_emb"][token_type_ids]
         + params["pos_emb"][None, :, :]).astype(jnp.float32).reshape(BS, H)

    # Additive key mask replicated per attention head: (B*NH, S, S).
    neg = (1.0 - attention_mask) * (-1e9)
    neg_g = jnp.broadcast_to(neg[:, None, None, :], (B, NH, S, S)).reshape(G, S, S)

    # Last-token selector, used in-kernel as a (B, BS) matmul (HF summary_type='last').
    # TODO(synk): picks the literal last position even if it is padding (matches HF).
    sel = jax.nn.one_hot(jnp.arange(B) * S + (S - 1), BS, dtype=jnp.float32)

    onehot = jax.nn.one_hot(label, NUM_LABELS, dtype=jnp.float32)

    logits, loss = xlnet_forward_fused(x, neg_g, sel, onehot, params)
    return {"loss": loss[0, 0], "logits": logits}


if __name__ == "__main__":
    key = jax.random.PRNGKey(0)
    k_par, k_ids, k_lab = jax.random.split(key, 3)

    params = init_params(k_par)

    input_ids = jax.random.randint(k_ids, (B, S), 0, VOCAB, dtype=jnp.int32)
    token_type_ids = jnp.concatenate(
        [jnp.zeros((B, S // 2), jnp.int32), jnp.ones((B, S // 2), jnp.int32)], axis=1)
    attention_mask = jnp.array(
        [[1, 1, 1, 1, 1, 1, 1, 1],
         [1, 1, 1, 1, 1, 1, 0, 0]], dtype=jnp.int32)   # second example padded
    labels = jax.random.randint(k_lab, (B,), 0, NUM_LABELS, dtype=jnp.int32)

    input_data = {"input_ids": input_ids,
                  "token_type_ids": token_type_ids,
                  "attention_mask": attention_mask}

    out = mymodel_forward(params, input_data, labels)
    jax.block_until_ready(out)

    assert out["logits"].shape == (B, NUM_LABELS)
    assert out["loss"].shape == ()
    assert bool(jnp.isfinite(out["loss"]))
    assert bool(jnp.all(jnp.isfinite(out["logits"])))
    print("KERNEL_OK")
</pallas_src>

<mosaic_0001>
module attributes {stable_mosaic.version = 11 : i64} {
  func.func @xlnet_fused_kernel(%arg0: memref<16x32xf32, #tpu.memory_space<vmem>>, %arg1: memref<8x8x8xf32, #tpu.memory_space<vmem>>, %arg2: memref<2x16xf32, #tpu.memory_space<vmem>>, %arg3: memref<2x2xf32, #tpu.memory_space<vmem>>, %arg4: memref<2x4x32x8xf32, #tpu.memory_space<vmem>>, %arg5: memref<2x4x32x8xf32, #tpu.memory_space<vmem>>, %arg6: memref<2x4x32x8xf32, #tpu.memory_space<vmem>>, %arg7: memref<2x4x8x32xf32, #tpu.memory_space<vmem>>, %arg8: memref<2x32x64xf32, #tpu.memory_space<vmem>>, %arg9: memref<2x1x64xf32, #tpu.memory_space<vmem>>, %arg10: memref<2x64x32xf32, #tpu.memory_space<vmem>>, %arg11: memref<2x5x32xf32, #tpu.memory_space<vmem>>, %arg12: memref<32x32xf32, #tpu.memory_space<vmem>>, %arg13: memref<1x32xf32, #tpu.memory_space<vmem>>, %arg14: memref<32x2xf32, #tpu.memory_space<vmem>>, %arg15: memref<1x2xf32, #tpu.memory_space<vmem>>, %arg16: memref<2x2xf32, #tpu.memory_space<vmem>>, %arg17: memref<1x1xf32, #tpu.memory_space<vmem>>) attributes {dimension_semantics = [], scalar_prefetch = 0 : i64, scratch_operands = 0 : i64, tpu.core_type = #tpu.core_type<tc>} {
    %c0 = arith.constant 0 : index
    %c0_0 = arith.constant 0 : index
    %0 = vector.load %arg0[%c0, %c0_0] : memref<16x32xf32, #tpu.memory_space<vmem>>, vector<16x32xf32>
    %c0_1 = arith.constant 0 : index
    %c0_2 = arith.constant 0 : index
    %c0_3 = arith.constant 0 : index
    %1 = vector.load %arg1[%c0_1, %c0_2, %c0_3] : memref<8x8x8xf32, #tpu.memory_space<vmem>>, vector<8x8x8xf32>
    %2 = vector.shape_cast %0 : vector<16x32xf32> to vector<2x1x8x32xf32>
    %3 = vector.shape_cast %2 : vector<2x1x8x32xf32> to vector<2x1x8x32xf32>
    %4 = vector.broadcast %3 : vector<2x1x8x32xf32> to vector<2x4x8x32xf32>
    %5 = vector.shape_cast %4 : vector<2x4x8x32xf32> to vector<8x8x32xf32>
    %c0_4 = arith.constant 0 : index
    %c0_5 = arith.constant 0 : index
    %c0_6 = arith.constant 0 : index
    %c0_7 = arith.constant 0 : index
    %6 = vector.load %arg4[%c0_4, %c0_5, %c0_6, %c0_7] : memref<2x4x32x8xf32, #tpu.memory_space<vmem>>, vector<1x4x32x8xf32>
    %7 = vector.shape_cast %6 : vector<1x4x32x8xf32> to vector<4x32x8xf32>
    %8 = vector.shape_cast %7 : vector<4x32x8xf32> to vector<1x4x32x8xf32>
    %9 = vector.shape_cast %8 : vector<1x4x32x8xf32> to vector<1x4x32x8xf32>
    %10 = vector.broadcast %9 : vector<1x4x32x8xf32> to vector<2x4x32x8xf32>
    %11 = vector.shape_cast %10 : vector<2x4x32x8xf32> to vector<8x32x8xf32>
    "tpu.trace_start"() <{level = 10 : i32, message = "gsh,ghd->gsd"}> : () -> ()
    %cst = arith.constant dense<0.000000e+00> : vector<8x8x8xf32>
    %12 = tpu.matmul %5, %11, %cst {dimension_numbers = #tpu.dot_dimension_numbers<[2], [1], [1], [2], [0, 0, 0, 1, 1, 2], [0], [0]>} : vector<8x8x32xf32>, vector<8x32x8xf32>, vector<8x8x8xf32> -> vector<8x8x8xf32>
    "tpu.trace_stop"() : () -> ()
    %c0_8 = arith.constant 0 : index
    %c0_9 = arith.constant 0 : index
    %c0_10 = arith.constant 0 : index
    %c0_11 = arith.constant 0 : index
    %13 = vector.load %arg5[%c0_8, %c0_9, %c0_10, %c0_11] : memref<2x4x32x8xf32, #tpu.memory_space<vmem>>, vector<1x4x32x8xf32>
    %14 = vector.shape_cast %13 : vector<1x4x32x8xf32> to vector<4x32x8xf32>
    %15 = vector.shape_cast %14 : vector<4x32x8xf32> to vector<1x4x32x8xf32>
    %16 = vector.shape_cast %15 : vector<1x4x32x8xf32> to vector<1x4x32x8xf32>
    %17 = vector.broadcast %16 : vector<1x4x32x8xf32> to vector<2x4x32x8xf32>
    %18 = vector.shape_cast %17 : vector<2x4x32x8xf32> to vector<8x32x8xf32>
    "tpu.trace_start"() <{level = 10 : i32, message = "gsh,ghd->gsd"}> : () -> ()
    %cst_12 = arith.constant dense<0.000000e+00> : vector<8x8x8xf32>
    %19 = tpu.matmul %5, %18, %cst_12 {dimension_numbers = #tpu.dot_dimension_numbers<[2], [1], [1], [2], [0, 0, 0, 1, 1, 2], [0], [0]>} : vector<8x8x32xf32>, vector<8x32x8xf32>, vector<8x8x8xf32> -> vector<8x8x8xf32>
    "tpu.trace_stop"() : () -> ()
    %c0_13 = arith.constant 0 : index
    %c0_14 = arith.constant 0 : index
    %c0_15 = arith.constant 0 : index
    %c0_16 = arith.constant 0 : index
    %20 = vector.load %arg6[%c0_13, %c0_14, %c0_15, %c0_16] : memref<2x4x32x8xf32, #tpu.memory_space<vmem>>, vector<1x4x32x8xf32>
    %21 = vector.shape_cast %20 : vector<1x4x32x8xf32> to vector<4x32x8xf32>
    %22 = vector.shape_cast %21 : vector<4x32x8xf32> to vector<1x4x32x8xf32>
    %23 = vector.shape_cast %22 : vector<1x4x32x8xf32> to vector<1x4x32x8xf32>
    %24 = vector.broadcast %23 : vector<1x4x32x8xf32> to vector<2x4x32x8xf32>
    %25 = vector.shape_cast %24 : vector<2x4x32x8xf32> to vector<8x32x8xf32>
    "tpu.trace_start"() <{level = 10 : i32, message = "gsh,ghd->gsd"}> : () -> ()
    %cst_17 = arith.constant dense<0.000000e+00> : vector<8x8x8xf32>
    %26 = tpu.matmul %5, %25, %cst_17 {dimension_numbers = #tpu.dot_dimension_numbers<[2], [1], [1], [2], [0, 0, 0, 1, 1, 2], [0], [0]>} : vector<8x8x32xf32>, vector<8x32x8xf32>, vector<8x8x8xf32> -> vector<8x8x8xf32>
    "tpu.trace_stop"() : () -> ()
    "tpu.trace_start"() <{level = 10 : i32, message = "gqd,gkd->gqk"}> : () -> ()
    %cst_18 = arith.constant dense<0.000000e+00> : vector<8x8x8xf32>
    %27 = tpu.matmul %12, %19, %cst_18 {dimension_numbers = #tpu.dot_dimension_numbers<[2], [2], [1], [1], [0, 0, 0, 1, 1, 1], [0], [0]>} : vector<8x8x8xf32>, vector<8x8x8xf32>, vector<8x8x8xf32> -> vector<8x8x8xf32>
    "tpu.trace_stop"() : () -> ()
    %28 = arith.addf %27, %1 : vector<8x8x8xf32>
    %cst_19 = arith.constant dense<0xFF800000> : vector<8x8xf32>
    %29 = vector.multi_reduction <maximumf>, %28, %cst_19 [2] : vector<8x8x8xf32> to vector<8x8xf32>
    %30 = vector.shape_cast %29 : vector<8x8xf32> to vector<8x8x1xf32>
    %31 = vector.broadcast %30 : vector<8x8x1xf32> to vector<8x8x8xf32>
    %32 = arith.subf %28, %31 : vector<8x8x8xf32>
    %33 = math.exp %32 : vector<8x8x8xf32>
    %cst_20 = arith.constant dense<0.000000e+00> : vector<8x8xf32>
    %34 = vector.multi_reduction <add>, %33, %cst_20 [2] : vector<8x8x8xf32> to vector<8x8xf32>
    %35 = vector.shape_cast %34 : vector<8x8xf32> to vector<8x8x1xf32>
    %36 = tpu.reciprocal %35 {approx = true} : vector<8x8x1xf32> -> vector<8x8x1xf32>
    %37 = vector.broadcast %36 : vector<8x8x1xf32> to vector<8x8x8xf32>
    %38 = arith.mulf %33, %37 : vector<8x8x8xf32>
    "tpu.trace_start"() <{level = 10 : i32, message = "gqk,gkd->gqd"}> : () -> ()
    %cst_21 = arith.constant dense<0.000000e+00> : vector<8x8x8xf32>
    %39 = tpu.matmul %38, %26, %cst_21 {dimension_numbers = #tpu.dot_dimension_numbers<[2], [1], [1], [2], [0, 0, 0, 1, 1, 2], [0], [0]>} : vector<8x8x8xf32>, vector<8x8x8xf32>, vector<8x8x8xf32> -> vector<8x8x8xf32>
    "tpu.trace_stop"() : () -> ()
    %c0_22 = arith.constant 0 : index
    %c0_23 = arith.constant 0 : index
    %c0_24 = arith.constant 0 : index
    %c0_25 = arith.constant 0 : index
    %40 = vector.load %arg7[%c0_22, %c0_23, %c0_24, %c0_25] : memref<2x4x8x32xf32, #tpu.memory_space<vmem>>, vector<1x4x8x32xf32>
    %41 = vector.shape_cast %40 : vector<1x4x8x32xf32> to vector<4x8x32xf32>
    %42 = vector.shape_cast %41 : vector<4x8x32xf32> to vector<1x4x8x32xf32>
    %43 = vector.shape_cast %42 : vector<1x4x8x32xf32> to vector<1x4x8x32xf32>
    %44 = vector.broadcast %43 : vector<1x4x8x32xf32> to vector<2x4x8x32xf32>
    %45 = vector.shape_cast %44 : vector<2x4x8x32xf32> to vector<8x8x32xf32>
    "tpu.trace_start"() <{level = 10 : i32, message = "gqd,gdh->gqh"}> : () -> ()
    %cst_26 = arith.constant dense<0.000000e+00> : vector<8x8x32xf32>
    %46 = tpu.matmul %39, %45, %cst_26 {dimension_numbers = #tpu.dot_dimension_numbers<[2], [1], [1], [2], [0, 0, 0, 1, 1, 2], [0], [0]>} : vector<8x8x8xf32>, vector<8x8x32xf32>, vector<8x8x32xf32> -> vector<8x8x32xf32>
    "tpu.trace_stop"() : () -> ()
    %47 = vector.shape_cast %46 : vector<8x8x32xf32> to vector<2x4x8x32xf32>
    %48 = vector.extract_strided_slice %47 {offsets = [0, 0, 0, 0], sizes = [2, 1, 8, 32], strides = [1, 1, 1, 1]} : vector<2x4x8x32xf32> to vector<2x1x8x32xf32>
    %49 = vector.shape_cast %48 : vector<2x1x8x32xf32> to vector<2x8x32xf32>
    %50 = vector.extract_strided_slice %47 {offsets = [0, 1, 0, 0], sizes = [2, 1, 8, 32], strides = [1, 1, 1, 1]} : vector<2x4x8x32xf32> to vector<2x1x8x32xf32>
    %51 = vector.shape_cast %50 : vector<2x1x8x32xf32> to vector<2x8x32xf32>
    %52 = arith.addf %49, %51 : vector<2x8x32xf32>
    %53 = vector.extract_strided_slice %47 {offsets = [0, 2, 0, 0], sizes = [2, 1, 8, 32], strides = [1, 1, 1, 1]} : vector<2x4x8x32xf32> to vector<2x1x8x32xf32>
    %54 = vector.shape_cast %53 : vector<2x1x8x32xf32> to vector<2x8x32xf32>
    %55 = arith.addf %52, %54 : vector<2x8x32xf32>
    %56 = vector.extract_strided_slice %47 {offsets = [0, 3, 0, 0], sizes = [2, 1, 8, 32], strides = [1, 1, 1, 1]} : vector<2x4x8x32xf32> to vector<2x1x8x32xf32>
    %57 = vector.shape_cast %56 : vector<2x1x8x32xf32> to vector<2x8x32xf32>
    %58 = arith.addf %55, %57 : vector<2x8x32xf32>
    %59 = vector.shape_cast %58 : vector<2x8x32xf32> to vector<16x32xf32>
    %c0_27 = arith.constant 0 : index
    %c0_28 = arith.constant 0 : index
    %c0_29 = arith.constant 0 : index
    %60 = vector.load %arg11[%c0_27, %c0_28, %c0_29] : memref<2x5x32xf32, #tpu.memory_space<vmem>>, vector<1x5x32xf32>
    %61 = vector.shape_cast %60 : vector<1x5x32xf32> to vector<5x32xf32>
    %62 = arith.addf %0, %59 : vector<16x32xf32>
    %63 = vector.extract_strided_slice %61 {offsets = [0, 0], sizes = [1, 32], strides = [1, 1]} : vector<5x32xf32> to vector<1x32xf32>
    %64 = vector.extract_strided_slice %61 {offsets = [1, 0], sizes = [1, 32], strides = [1, 1]} : vector<5x32xf32> to vector<1x32xf32>
    %cst_30 = arith.constant dense<0.000000e+00> : vector<16xf32>
    %65 = vector.multi_reduction <add>, %62, %cst_30 [1] : vector<16x32xf32> to vector<16xf32>
    %66 = vector.shape_cast %65 : vector<16xf32> to vector<16x1xf32>
    %cst_31 = arith.constant 3.200000e+01 : f32
    %67 = vector.broadcast %cst_31 : f32 to vector<16x1xf32>
    %68 = arith.divf %66, %67 : vector<16x1xf32>
    %69 = vector.broadcast %68 : vector<16x1xf32> to vector<16x32xf32>
    %70 = arith.subf %62, %69 : vector<16x32xf32>
    %71 = arith.mulf %70, %70 : vector<16x32xf32>
    %cst_32 = arith.constant dense<0.000000e+00> : vector<16xf32>
    %72 = vector.multi_reduction <add>, %71, %cst_32 [1] : vector<16x32xf32> to vector<16xf32>
    %73 = vector.shape_cast %72 : vector<16xf32> to vector<16x1xf32>
    %cst_33 = arith.constant 3.200000e+01 : f32
    %74 = vector.broadcast %cst_33 : f32 to vector<16x1xf32>
    %75 = arith.divf %73, %74 : vector<16x1xf32>
    %76 = vector.broadcast %68 : vector<16x1xf32> to vector<16x32xf32>
    %77 = arith.subf %62, %76 : vector<16x32xf32>
    %cst_34 = arith.constant 9.99999996E-13 : f32
    %78 = vector.broadcast %cst_34 : f32 to vector<16x1xf32>
    %79 = arith.addf %75, %78 : vector<16x1xf32>
    %80 = math.rsqrt %79 : vector<16x1xf32>
    %81 = vector.broadcast %80 : vector<16x1xf32> to vector<16x32xf32>
    %82 = arith.mulf %77, %81 : vector<16x32xf32>
    %83 = vector.broadcast %63 : vector<1x32xf32> to vector<16x32xf32>
    %84 = arith.mulf %82, %83 : vector<16x32xf32>
    %85 = vector.broadcast %64 : vector<1x32xf32> to vector<16x32xf32>
    %86 = arith.addf %84, %85 : vector<16x32xf32>
    %c0_35 = arith.constant 0 : index
    %c0_36 = arith.constant 0 : index
    %c0_37 = arith.constant 0 : index
    %87 = vector.load %arg8[%c0_35, %c0_36, %c0_37] : memref<2x32x64xf32, #tpu.memory_space<vmem>>, vector<1x32x64xf32>
    %88 = vector.shape_cast %87 : vector<1x32x64xf32> to vector<32x64xf32>
    %cst_38 = arith.constant dense<0.000000e+00> : vector<16x64xf32>
    %89 = tpu.matmul %86, %88, %cst_38 {dimension_numbers = #tpu.dot_dimension_numbers<[1], [0], [0], [1], [0, 0, 1, 1], [], []>} : vector<16x32xf32>, vector<32x64xf32>, vector<16x64xf32> -> vector<16x64xf32>
    %c0_39 = arith.constant 0 : index
    %c0_40 = arith.constant 0 : index
    %c0_41 = arith.constant 0 : index
    %90 = vector.load %arg9[%c0_39, %c0_40, %c0_41] : memref<2x1x64xf32, #tpu.memory_space<vmem>>, vector<1x1x64xf32>
    %91 = vector.shape_cast %90 : vector<1x1x64xf32> to vector<1x64xf32>
    %92 = vector.broadcast %91 : vector<1x64xf32> to vector<16x64xf32>
    %93 = arith.addf %89, %92 : vector<16x64xf32>
    %94 = arith.mulf %93, %93 : vector<16x64xf32>
    %95 = arith.mulf %93, %94 : vector<16x64xf32>
    %cst_42 = arith.constant 4.471500e-02 : f32
    %96 = vector.broadcast %cst_42 : f32 to vector<16x64xf32>
    %97 = arith.mulf %96, %95 : vector<16x64xf32>
    %98 = arith.addf %93, %97 : vector<16x64xf32>
    %cst_43 = arith.constant 0.797884583 : f32
    %99 = vector.broadcast %cst_43 : f32 to vector<16x64xf32>
    %100 = arith.mulf %99, %98 : vector<16x64xf32>
    %101 = math.tanh %100 : vector<16x64xf32>
    %cst_44 = arith.constant 1.000000e+00 : f32
    %102 = vector.broadcast %cst_44 : f32 to vector<16x64xf32>
    %103 = arith.addf %102, %101 : vector<16x64xf32>
    %cst_45 = arith.constant 5.000000e-01 : f32
    %104 = vector.broadcast %cst_45 : f32 to vector<16x64xf32>
    %105 = arith.mulf %104, %103 : vector<16x64xf32>
    %106 = arith.mulf %93, %105 : vector<16x64xf32>
    %c0_46 = arith.constant 0 : index
    %c0_47 = arith.constant 0 : index
    %c0_48 = arith.constant 0 : index
    %107 = vector.load %arg10[%c0_46, %c0_47, %c0_48] : memref<2x64x32xf32, #tpu.memory_space<vmem>>, vector<1x64x32xf32>
    %108 = vector.shape_cast %107 : vector<1x64x32xf32> to vector<64x32xf32>
    %cst_49 = arith.constant dense<0.000000e+00> : vector<16x32xf32>
    %109 = tpu.matmul %106, %108, %cst_49 {dimension_numbers = #tpu.dot_dimension_numbers<[1], [0], [0], [1], [0, 0, 1, 1], [], []>} : vector<16x64xf32>, vector<64x32xf32>, vector<16x32xf32> -> vector<16x32xf32>
    %110 = vector.extract_strided_slice %61 {offsets = [2, 0], sizes = [1, 32], strides = [1, 1]} : vector<5x32xf32> to vector<1x32xf32>
    %111 = vector.broadcast %110 : vector<1x32xf32> to vector<16x32xf32>
    %112 = arith.addf %109, %111 : vector<16x32xf32>
    %113 = arith.addf %86, %112 : vector<16x32xf32>
    %114 = vector.extract_strided_slice %61 {offsets = [3, 0], sizes = [1, 32], strides = [1, 1]} : vector<5x32xf32> to vector<1x32xf32>
    %115 = vector.extract_strided_slice %61 {offsets = [4, 0], sizes = [1, 32], strides = [1, 1]} : vector<5x32xf32> to vector<1x32xf32>
    %cst_50 = arith.constant dense<0.000000e+00> : vector<16xf32>
    %116 = vector.multi_reduction <add>, %113, %cst_50 [1] : vector<16x32xf32> to vector<16xf32>
    %117 = vector.shape_cast %116 : vector<16xf32> to vector<16x1xf32>
    %cst_51 = arith.constant 3.200000e+01 : f32
    %118 = vector.broadcast %cst_51 : f32 to vector<16x1xf32>
    %119 = arith.divf %117, %118 : vector<16x1xf32>
    %120 = vector.broadcast %119 : vector<16x1xf32> to vector<16x32xf32>
    %121 = arith.subf %113, %120 : vector<16x32xf32>
    %122 = arith.mulf %121, %121 : vector<16x32xf32>
    %cst_52 = arith.constant dense<0.000000e+00> : vector<16xf32>
    %123 = vector.multi_reduction <add>, %122, %cst_52 [1] : vector<16x32xf32> to vector<16xf32>
    %124 = vector.shape_cast %123 : vector<16xf32> to vector<16x1xf32>
    %cst_53 = arith.constant 3.200000e+01 : f32
    %125 = vector.broadcast %cst_53 : f32 to vector<16x1xf32>
    %126 = arith.divf %124, %125 : vector<16x1xf32>
    %127 = vector.broadcast %119 : vector<16x1xf32> to vector<16x32xf32>
    %128 = arith.subf %113, %127 : vector<16x32xf32>
    %cst_54 = arith.constant 9.99999996E-13 : f32
    %129 = vector.broadcast %cst_54 : f32 to vector<16x1xf32>
    %130 = arith.addf %126, %129 : vector<16x1xf32>
    %131 = math.rsqrt %130 : vector<16x1xf32>
    %132 = vector.broadcast %131 : vector<16x1xf32> to vector<16x32xf32>
    %133 = arith.mulf %128, %132 : vector<16x32xf32>
    %134 = vector.broadcast %114 : vector<1x32xf32> to vector<16x32xf32>
    %135 = arith.mulf %133, %134 : vector<16x32xf32>
    %136 = vector.broadcast %115 : vector<1x32xf32> to vector<16x32xf32>
    %137 = arith.addf %135, %136 : vector<16x32xf32>
    %138 = vector.shape_cast %137 : vector<16x32xf32> to vector<2x1x8x32xf32>
    %139 = vector.shape_cast %138 : vector<2x1x8x32xf32> to vector<2x1x8x32xf32>
    %140 = vector.broadcast %139 : vector<2x1x8x32xf32> to vector<2x4x8x32xf32>
    %141 = vector.shape_cast %140 : vector<2x4x8x32xf32> to vector<8x8x32xf32>
    %c1 = arith.constant 1 : index
    %c0_55 = arith.constant 0 : index
    %c0_56 = arith.constant 0 : index
    %c0_57 = arith.constant 0 : index
    %142 = vector.load %arg4[%c1, %c0_55, %c0_56, %c0_57] : memref<2x4x32x8xf32, #tpu.memory_space<vmem>>, vector<1x4x32x8xf32>
    %143 = vector.shape_cast %142 : vector<1x4x32x8xf32> to vector<4x32x8xf32>
    %144 = vector.shape_cast %143 : vector<4x32x8xf32> to vector<1x4x32x8xf32>
    %145 = vector.shape_cast %144 : vector<1x4x32x8xf32> to vector<1x4x32x8xf32>
    %146 = vector.broadcast %145 : vector<1x4x32x8xf32> to vector<2x4x32x8xf32>
    %147 = vector.shape_cast %146 : vector<2x4x32x8xf32> to vector<8x32x8xf32>
    "tpu.trace_start"() <{level = 10 : i32, message = "gsh,ghd->gsd"}> : () -> ()
    %cst_58 = arith.constant dense<0.000000e+00> : vector<8x8x8xf32>
    %148 = tpu.matmul %141, %147, %cst_58 {dimension_numbers = #tpu.dot_dimension_numbers<[2], [1], [1], [2], [0, 0, 0, 1, 1, 2], [0], [0]>} : vector<8x8x32xf32>, vector<8x32x8xf32>, vector<8x8x8xf32> -> vector<8x8x8xf32>
    "tpu.trace_stop"() : () -> ()
    %c1_59 = arith.constant 1 : index
    %c0_60 = arith.constant 0 : index
    %c0_61 = arith.constant 0 : index
    %c0_62 = arith.constant 0 : index
    %149 = vector.load %arg5[%c1_59, %c0_60, %c0_61, %c0_62] : memref<2x4x32x8xf32, #tpu.memory_space<vmem>>, vector<1x4x32x8xf32>
    %150 = vector.shape_cast %149 : vector<1x4x32x8xf32> to vector<4x32x8xf32>
    %151 = vector.shape_cast %150 : vector<4x32x8xf32> to vector<1x4x32x8xf32>
    %152 = vector.shape_cast %151 : vector<1x4x32x8xf32> to vector<1x4x32x8xf32>
    %153 = vector.broadcast %152 : vector<1x4x32x8xf32> to vector<2x4x32x8xf32>
    %154 = vector.shape_cast %153 : vector<2x4x32x8xf32> to vector<8x32x8xf32>
    "tpu.trace_start"() <{level = 10 : i32, message = "gsh,ghd->gsd"}> : () -> ()
    %cst_63 = arith.constant dense<0.000000e+00> : vector<8x8x8xf32>
    %155 = tpu.matmul %141, %154, %cst_63 {dimension_numbers = #tpu.dot_dimension_numbers<[2], [1], [1], [2], [0, 0, 0, 1, 1, 2], [0], [0]>} : vector<8x8x32xf32>, vector<8x32x8xf32>, vector<8x8x8xf32> -> vector<8x8x8xf32>
    "tpu.trace_stop"() : () -> ()
    %c1_64 = arith.constant 1 : index
    %c0_65 = arith.constant 0 : index
    %c0_66 = arith.constant 0 : index
    %c0_67 = arith.constant 0 : index
    %156 = vector.load %arg6[%c1_64, %c0_65, %c0_66, %c0_67] : memref<2x4x32x8xf32, #tpu.memory_space<vmem>>, vector<1x4x32x8xf32>
    %157 = vector.shape_cast %156 : vector<1x4x32x8xf32> to vector<4x32x8xf32>
    %158 = vector.shape_cast %157 : vector<4x32x8xf32> to vector<1x4x32x8xf32>
    %159 = vector.shape_cast %158 : vector<1x4x32x8xf32> to vector<1x4x32x8xf32>
    %160 = vector.broadcast %159 : vector<1x4x32x8xf32> to vector<2x4x32x8xf32>
    %161 = vector.shape_cast %160 : vector<2x4x32x8xf32> to vector<8x32x8xf32>
    "tpu.trace_start"() <{level = 10 : i32, message = "gsh,ghd->gsd"}> : () -> ()
    %cst_68 = arith.constant dense<0.000000e+00> : vector<8x8x8xf32>
    %162 = tpu.matmul %141, %161, %cst_68 {dimension_numbers = #tpu.dot_dimension_numbers<[2], [1], [1], [2], [0, 0, 0, 1, 1, 2], [0], [0]>} : vector<8x8x32xf32>, vector<8x32x8xf32>, vector<8x8x8xf32> -> vector<8x8x8xf32>
    "tpu.trace_stop"() : () -> ()
    "tpu.trace_start"() <{level = 10 : i32, message = "gqd,gkd->gqk"}> : () -> ()
    %cst_69 = arith.constant dense<0.000000e+00> : vector<8x8x8xf32>
    %163 = tpu.matmul %148, %155, %cst_69 {dimension_numbers = #tpu.dot_dimension_numbers<[2], [2], [1], [1], [0, 0, 0, 1, 1, 1], [0], [0]>} : vector<8x8x8xf32>, vector<8x8x8xf32>, vector<8x8x8xf32> -> vector<8x8x8xf32>
    "tpu.trace_stop"() : () -> ()
    %164 = arith.addf %163, %1 : vector<8x8x8xf32>
    %cst_70 = arith.constant dense<0xFF800000> : vector<8x8xf32>
    %165 = vector.multi_reduction <maximumf>, %164, %cst_70 [2] : vector<8x8x8xf32> to vector<8x8xf32>
    %166 = vector.shape_cast %165 : vector<8x8xf32> to vector<8x8x1xf32>
    %167 = vector.broadcast %166 : vector<8x8x1xf32> to vector<8x8x8xf32>
    %168 = arith.subf %164, %167 : vector<8x8x8xf32>
    %169 = math.exp %168 : vector<8x8x8xf32>
    %cst_71 = arith.constant dense<0.000000e+00> : vector<8x8xf32>
    %170 = vector.multi_reduction <add>, %169, %cst_71 [2] : vector<8x8x8xf32> to vector<8x8xf32>
    %171 = vector.shape_cast %170 : vector<8x8xf32> to vector<8x8x1xf32>
    %172 = tpu.reciprocal %171 {approx = true} : vector<8x8x1xf32> -> vector<8x8x1xf32>
    %173 = vector.broadcast %172 : vector<8x8x1xf32> to vector<8x8x8xf32>
    %174 = arith.mulf %169, %173 : vector<8x8x8xf32>
    "tpu.trace_start"() <{level = 10 : i32, message = "gqk,gkd->gqd"}> : () -> ()
    %cst_72 = arith.constant dense<0.000000e+00> : vector<8x8x8xf32>
    %175 = tpu.matmul %174, %162, %cst_72 {dimension_numbers = #tpu.dot_dimension_numbers<[2], [1], [1], [2], [0, 0, 0, 1, 1, 2], [0], [0]>} : vector<8x8x8xf32>, vector<8x8x8xf32>, vector<8x8x8xf32> -> vector<8x8x8xf32>
    "tpu.trace_stop"() : () -> ()
    %c1_73 = arith.constant 1 : index
    %c0_74 = arith.constant 0 : index
    %c0_75 = arith.constant 0 : index
    %c0_76 = arith.constant 0 : index
    %176 = vector.load %arg7[%c1_73, %c0_74, %c0_75, %c0_76] : memref<2x4x8x32xf32, #tpu.memory_space<vmem>>, vector<1x4x8x32xf32>
    %177 = vector.shape_cast %176 : vector<1x4x8x32xf32> to vector<4x8x32xf32>
    %178 = vector.shape_cast %177 : vector<4x8x32xf32> to vector<1x4x8x32xf32>
    %179 = vector.shape_cast %178 : vector<1x4x8x32xf32> to vector<1x4x8x32xf32>
    %180 = vector.broadcast %179 : vector<1x4x8x32xf32> to vector<2x4x8x32xf32>
    %181 = vector.shape_cast %180 : vector<2x4x8x32xf32> to vector<8x8x32xf32>
    "tpu.trace_start"() <{level = 10 : i32, message = "gqd,gdh->gqh"}> : () -> ()
    %cst_77 = arith.constant dense<0.000000e+00> : vector<8x8x32xf32>
    %182 = tpu.matmul %175, %181, %cst_77 {dimension_numbers = #tpu.dot_dimension_numbers<[2], [1], [1], [2], [0, 0, 0, 1, 1, 2], [0], [0]>} : vector<8x8x8xf32>, vector<8x8x32xf32>, vector<8x8x32xf32> -> vector<8x8x32xf32>
    "tpu.trace_stop"() : () -> ()
    %183 = vector.shape_cast %182 : vector<8x8x32xf32> to vector<2x4x8x32xf32>
    %184 = vector.extract_strided_slice %183 {offsets = [0, 0, 0, 0], sizes = [2, 1, 8, 32], strides = [1, 1, 1, 1]} : vector<2x4x8x32xf32> to vector<2x1x8x32xf32>
    %185 = vector.shape_cast %184 : vector<2x1x8x32xf32> to vector<2x8x32xf32>
    %186 = vector.extract_strided_slice %183 {offsets = [0, 1, 0, 0], sizes = [2, 1, 8, 32], strides = [1, 1, 1, 1]} : vector<2x4x8x32xf32> to vector<2x1x8x32xf32>
    %187 = vector.shape_cast %186 : vector<2x1x8x32xf32> to vector<2x8x32xf32>
    %188 = arith.addf %185, %187 : vector<2x8x32xf32>
    %189 = vector.extract_strided_slice %183 {offsets = [0, 2, 0, 0], sizes = [2, 1, 8, 32], strides = [1, 1, 1, 1]} : vector<2x4x8x32xf32> to vector<2x1x8x32xf32>
    %190 = vector.shape_cast %189 : vector<2x1x8x32xf32> to vector<2x8x32xf32>
    %191 = arith.addf %188, %190 : vector<2x8x32xf32>
    %192 = vector.extract_strided_slice %183 {offsets = [0, 3, 0, 0], sizes = [2, 1, 8, 32], strides = [1, 1, 1, 1]} : vector<2x4x8x32xf32> to vector<2x1x8x32xf32>
    %193 = vector.shape_cast %192 : vector<2x1x8x32xf32> to vector<2x8x32xf32>
    %194 = arith.addf %191, %193 : vector<2x8x32xf32>
    %195 = vector.shape_cast %194 : vector<2x8x32xf32> to vector<16x32xf32>
    %c1_78 = arith.constant 1 : index
    %c0_79 = arith.constant 0 : index
    %c0_80 = arith.constant 0 : index
    %196 = vector.load %arg11[%c1_78, %c0_79, %c0_80] : memref<2x5x32xf32, #tpu.memory_space<vmem>>, vector<1x5x32xf32>
    %197 = vector.shape_cast %196 : vector<1x5x32xf32> to vector<5x32xf32>
    %198 = arith.addf %137, %195 : vector<16x32xf32>
    %199 = vector.extract_strided_slice %197 {offsets = [0, 0], sizes = [1, 32], strides = [1, 1]} : vector<5x32xf32> to vector<1x32xf32>
    %200 = vector.extract_strided_slice %197 {offsets = [1, 0], sizes = [1, 32], strides = [1, 1]} : vector<5x32xf32> to vector<1x32xf32>
    %cst_81 = arith.constant dense<0.000000e+00> : vector<16xf32>
    %201 = vector.multi_reduction <add>, %198, %cst_81 [1] : vector<16x32xf32> to vector<16xf32>
    %202 = vector.shape_cast %201 : vector<16xf32> to vector<16x1xf32>
    %cst_82 = arith.constant 3.200000e+01 : f32
    %203 = vector.broadcast %cst_82 : f32 to vector<16x1xf32>
    %204 = arith.divf %202, %203 : vector<16x1xf32>
    %205 = vector.broadcast %204 : vector<16x1xf32> to vector<16x32xf32>
    %206 = arith.subf %198, %205 : vector<16x32xf32>
    %207 = arith.mulf %206, %206 : vector<16x32xf32>
    %cst_83 = arith.constant dense<0.000000e+00> : vector<16xf32>
    %208 = vector.multi_reduction <add>, %207, %cst_83 [1] : vector<16x32xf32> to vector<16xf32>
    %209 = vector.shape_cast %208 : vector<16xf32> to vector<16x1xf32>
    %cst_84 = arith.constant 3.200000e+01 : f32
    %210 = vector.broadcast %cst_84 : f32 to vector<16x1xf32>
    %211 = arith.divf %209, %210 : vector<16x1xf32>
    %212 = vector.broadcast %204 : vector<16x1xf32> to vector<16x32xf32>
    %213 = arith.subf %198, %212 : vector<16x32xf32>
    %cst_85 = arith.constant 9.99999996E-13 : f32
    %214 = vector.broadcast %cst_85 : f32 to vector<16x1xf32>
    %215 = arith.addf %211, %214 : vector<16x1xf32>
    %216 = math.rsqrt %215 : vector<16x1xf32>
    %217 = vector.broadcast %216 : vector<16x1xf32> to vector<16x32xf32>
    %218 = arith.mulf %213, %217 : vector<16x32xf32>
    %219 = vector.broadcast %199 : vector<1x32xf32> to vector<16x32xf32>
    %220 = arith.mulf %218, %219 : vector<16x32xf32>
    %221 = vector.broadcast %200 : vector<1x32xf32> to vector<16x32xf32>
    %222 = arith.addf %220, %221 : vector<16x32xf32>
    %c1_86 = arith.constant 1 : index
    %c0_87 = arith.constant 0 : index
    %c0_88 = arith.constant 0 : index
    %223 = vector.load %arg8[%c1_86, %c0_87, %c0_88] : memref<2x32x64xf32, #tpu.memory_space<vmem>>, vector<1x32x64xf32>
    %224 = vector.shape_cast %223 : vector<1x32x64xf32> to vector<32x64xf32>
    %cst_89 = arith.constant dense<0.000000e+00> : vector<16x64xf32>
    %225 = tpu.matmul %222, %224, %cst_89 {dimension_numbers = #tpu.dot_dimension_numbers<[1], [0], [0], [1], [0, 0, 1, 1], [], []>} : vector<16x32xf32>, vector<32x64xf32>, vector<16x64xf32> -> vector<16x64xf32>
    %c1_90 = arith.constant 1 : index
    %c0_91 = arith.constant 0 : index
    %c0_92 = arith.constant 0 : index
    %226 = vector.load %arg9[%c1_90, %c0_91, %c0_92] : memref<2x1x64xf32, #tpu.memory_space<vmem>>, vector<1x1x64xf32>
    %227 = vector.shape_cast %226 : vector<1x1x64xf32> to vector<1x64xf32>
    %228 = vector.broadcast %227 : vector<1x64xf32> to vector<16x64xf32>
    %229 = arith.addf %225, %228 : vector<16x64xf32>
    %230 = arith.mulf %229, %229 : vector<16x64xf32>
    %231 = arith.mulf %229, %230 : vector<16x64xf32>
    %cst_93 = arith.constant 4.471500e-02 : f32
    %232 = vector.broadcast %cst_93 : f32 to vector<16x64xf32>
    %233 = arith.mulf %232, %231 : vector<16x64xf32>
    %234 = arith.addf %229, %233 : vector<16x64xf32>
    %cst_94 = arith.constant 0.797884583 : f32
    %235 = vector.broadcast %cst_94 : f32 to vector<16x64xf32>
    %236 = arith.mulf %235, %234 : vector<16x64xf32>
    %237 = math.tanh %236 : vector<16x64xf32>
    %cst_95 = arith.constant 1.000000e+00 : f32
    %238 = vector.broadcast %cst_95 : f32 to vector<16x64xf32>
    %239 = arith.addf %238, %237 : vector<16x64xf32>
    %cst_96 = arith.constant 5.000000e-01 : f32
    %240 = vector.broadcast %cst_96 : f32 to vector<16x64xf32>
    %241 = arith.mulf %240, %239 : vector<16x64xf32>
    %242 = arith.mulf %229, %241 : vector<16x64xf32>
    %c1_97 = arith.constant 1 : index
    %c0_98 = arith.constant 0 : index
    %c0_99 = arith.constant 0 : index
    %243 = vector.load %arg10[%c1_97, %c0_98, %c0_99] : memref<2x64x32xf32, #tpu.memory_space<vmem>>, vector<1x64x32xf32>
    %244 = vector.shape_cast %243 : vector<1x64x32xf32> to vector<64x32xf32>
    %cst_100 = arith.constant dense<0.000000e+00> : vector<16x32xf32>
    %245 = tpu.matmul %242, %244, %cst_100 {dimension_numbers = #tpu.dot_dimension_numbers<[1], [0], [0], [1], [0, 0, 1, 1], [], []>} : vector<16x64xf32>, vector<64x32xf32>, vector<16x32xf32> -> vector<16x32xf32>
    %246 = vector.extract_strided_slice %197 {offsets = [2, 0], sizes = [1, 32], strides = [1, 1]} : vector<5x32xf32> to vector<1x32xf32>
    %247 = vector.broadcast %246 : vector<1x32xf32> to vector<16x32xf32>
    %248 = arith.addf %245, %247 : vector<16x32xf32>
    %249 = arith.addf %222, %248 : vector<16x32xf32>
    %250 = vector.extract_strided_slice %197 {offsets = [3, 0], sizes = [1, 32], strides = [1, 1]} : vector<5x32xf32> to vector<1x32xf32>
    %251 = vector.extract_strided_slice %197 {offsets = [4, 0], sizes = [1, 32], strides = [1, 1]} : vector<5x32xf32> to vector<1x32xf32>
    %cst_101 = arith.constant dense<0.000000e+00> : vector<16xf32>
    %252 = vector.multi_reduction <add>, %249, %cst_101 [1] : vector<16x32xf32> to vector<16xf32>
    %253 = vector.shape_cast %252 : vector<16xf32> to vector<16x1xf32>
    %cst_102 = arith.constant 3.200000e+01 : f32
    %254 = vector.broadcast %cst_102 : f32 to vector<16x1xf32>
    %255 = arith.divf %253, %254 : vector<16x1xf32>
    %256 = vector.broadcast %255 : vector<16x1xf32> to vector<16x32xf32>
    %257 = arith.subf %249, %256 : vector<16x32xf32>
    %258 = arith.mulf %257, %257 : vector<16x32xf32>
    %cst_103 = arith.constant dense<0.000000e+00> : vector<16xf32>
    %259 = vector.multi_reduction <add>, %258, %cst_103 [1] : vector<16x32xf32> to vector<16xf32>
    %260 = vector.shape_cast %259 : vector<16xf32> to vector<16x1xf32>
    %cst_104 = arith.constant 3.200000e+01 : f32
    %261 = vector.broadcast %cst_104 : f32 to vector<16x1xf32>
    %262 = arith.divf %260, %261 : vector<16x1xf32>
    %263 = vector.broadcast %255 : vector<16x1xf32> to vector<16x32xf32>
    %264 = arith.subf %249, %263 : vector<16x32xf32>
    %cst_105 = arith.constant 9.99999996E-13 : f32
    %265 = vector.broadcast %cst_105 : f32 to vector<16x1xf32>
    %266 = arith.addf %262, %265 : vector<16x1xf32>
    %267 = math.rsqrt %266 : vector<16x1xf32>
    %268 = vector.broadcast %267 : vector<16x1xf32> to vector<16x32xf32>
    %269 = arith.mulf %264, %268 : vector<16x32xf32>
    %270 = vector.broadcast %250 : vector<1x32xf32> to vector<16x32xf32>
    %271 = arith.mulf %269, %270 : vector<16x32xf32>
    %272 = vector.broadcast %251 : vector<1x32xf32> to vector<16x32xf32>
    %273 = arith.addf %271, %272 : vector<16x32xf32>
    %c0_106 = arith.constant 0 : index
    %c0_107 = arith.constant 0 : index
    %274 = vector.load %arg2[%c0_106, %c0_107] : memref<2x16xf32, #tpu.memory_space<vmem>>, vector<2x16xf32>
    %cst_108 = arith.constant dense<0.000000e+00> : vector<2x32xf32>
    %275 = tpu.matmul %274, %273, %cst_108 {dimension_numbers = #tpu.dot_dimension_numbers<[1], [0], [0], [1], [0, 0, 1, 1], [], []>} : vector<2x16xf32>, vector<16x32xf32>, vector<2x32xf32> -> vector<2x32xf32>
    %c0_109 = arith.constant 0 : index
    %c0_110 = arith.constant 0 : index
    %276 = vector.load %arg12[%c0_109, %c0_110] : memref<32x32xf32, #tpu.memory_space<vmem>>, vector<32x32xf32>
    %cst_111 = arith.constant dense<0.000000e+00> : vector<2x32xf32>
    %277 = tpu.matmul %275, %276, %cst_111 {dimension_numbers = #tpu.dot_dimension_numbers<[1], [0], [0], [1], [0, 0, 1, 1], [], []>} : vector<2x32xf32>, vector<32x32xf32>, vector<2x32xf32> -> vector<2x32xf32>
    %c0_112 = arith.constant 0 : index
    %c0_113 = arith.constant 0 : index
    %278 = vector.load %arg13[%c0_112, %c0_113] : memref<1x32xf32, #tpu.memory_space<vmem>>, vector<1x32xf32>
    %279 = vector.broadcast %278 : vector<1x32xf32> to vector<2x32xf32>
    %280 = arith.addf %277, %279 : vector<2x32xf32>
    %281 = math.tanh %280 : vector<2x32xf32>
    %c0_114 = arith.constant 0 : index
    %c0_115 = arith.constant 0 : index
    %282 = vector.load %arg14[%c0_114, %c0_115] : memref<32x2xf32, #tpu.memory_space<vmem>>, vector<32x2xf32>
    %cst_116 = arith.constant dense<0.000000e+00> : vector<2x2xf32>
    %283 = tpu.matmul %281, %282, %cst_116 {dimension_numbers = #tpu.dot_dimension_numbers<[1], [0], [0], [1], [0, 0, 1, 1], [], []>} : vector<2x32xf32>, vector<32x2xf32>, vector<2x2xf32> -> vector<2x2xf32>
    %c0_117 = arith.constant 0 : index
    %c0_118 = arith.constant 0 : index
    %284 = vector.load %arg15[%c0_117, %c0_118] : memref<1x2xf32, #tpu.memory_space<vmem>>, vector<1x2xf32>
    %285 = vector.broadcast %284 : vector<1x2xf32> to vector<2x2xf32>
    %286 = arith.addf %283, %285 : vector<2x2xf32>
    %c0_119 = arith.constant 0 : index
    %c0_120 = arith.constant 0 : index
    %287 = vector.load %arg16[%c0_119, %c0_120] : memref<2x2xf32, #tpu.memory_space<vmem>>, vector<2x2xf32>
    tpu.vector_store %arg16[%c0_119, %c0_120], %286 {strides = array<i32>} : memref<2x2xf32, #tpu.memory_space<vmem>>, vector<2x2xf32>,
    %cst_121 = arith.constant dense<0xFF800000> : vector<2xf32>
    %288 = vector.multi_reduction <maximumf>, %286, %cst_121 [1] : vector<2x2xf32> to vector<2xf32>
    %289 = vector.shape_cast %288 : vector<2xf32> to vector<2x1xf32>
    %290 = vector.broadcast %289 : vector<2x1xf32> to vector<2x2xf32>
    %291 = arith.subf %286, %290 : vector<2x2xf32>
    %292 = math.exp %291 : vector<2x2xf32>
    %cst_122 = arith.constant dense<0.000000e+00> : vector<2xf32>
    %293 = vector.multi_reduction <add>, %292, %cst_122 [1] : vector<2x2xf32> to vector<2xf32>
    %294 = vector.shape_cast %293 : vector<2xf32> to vector<2x1xf32>
    %295 = math.log %294 : vector<2x1xf32>
    %296 = vector.broadcast %295 : vector<2x1xf32> to vector<2x2xf32>
    %297 = arith.subf %291, %296 : vector<2x2xf32>
    %c0_123 = arith.constant 0 : index
    %c0_124 = arith.constant 0 : index
    %298 = vector.load %arg3[%c0_123, %c0_124] : memref<2x2xf32, #tpu.memory_space<vmem>>, vector<2x2xf32>
    %299 = arith.mulf %298, %297 : vector<2x2xf32>
    %cst_125 = arith.constant dense<0.000000e+00> : vector<2xf32>
    %300 = vector.multi_reduction <add>, %299, %cst_125 [1] : vector<2x2xf32> to vector<2xf32>
    %301 = vector.shape_cast %300 : vector<2xf32> to vector<2x1xf32>
    %cst_126 = arith.constant 0.000000e+00 : f32
    %302 = vector.broadcast %cst_126 : f32 to vector<2x1xf32>
    %303 = arith.subf %302, %301 : vector<2x1xf32>
    %304 = vector.shape_cast %303 : vector<2x1xf32> to vector<1x2x1xf32>
    %cst_127 = arith.constant dense<0.000000e+00> : vector<1xf32>
    %305 = vector.multi_reduction <add>, %304, %cst_127 [1, 2] : vector<1x2x1xf32> to vector<1xf32>
    %306 = vector.shape_cast %305 : vector<1xf32> to vector<1x1x1xf32>
    %307 = vector.extract %306[0, 0, 0] : f32 from vector<1x1x1xf32>
    %308 = vector.broadcast %307 : f32 to vector<1x1xf32>
    %cst_128 = arith.constant 5.000000e-01 : f32
    %309 = vector.broadcast %cst_128 : f32 to vector<1x1xf32>
    %310 = arith.mulf %308, %309 : vector<1x1xf32>
    %c0_129 = arith.constant 0 : index
    %c0_130 = arith.constant 0 : index
    %311 = vector.load %arg17[%c0_129, %c0_130] : memref<1x1xf32, #tpu.memory_space<vmem>>, vector<1x1xf32>
    tpu.vector_store %arg17[%c0_129, %c0_130], %310 {strides = array<i32>} : memref<1x1xf32, #tpu.memory_space<vmem>>, vector<1x1xf32>,
    return
  }
}

</mosaic_0001>

<bundles_post_ra>
// kernel: tpu_custom_call.1
= control target key start
LH: loop header
LB: loop body
LE: loop exit
PB: predicated region body
PF: predicated region fallthrough
CT: control target
= control target key end

     0   :  { %s4283_s0 = inlined_call_operand.vmem [shape: f32[16,32], index: 0, kind: input, shape index: {}]   ;;  %s4284_s1 = inlined_call_operand.vmem [shape: f32[8,8,8], index: 1, kind: input, shape index: {}]   ;;  %s4285_s2 = inlined_call_operand.vmem [shape: f32[2,16], index: 2, kind: input, shape index: {}]   ;;  %s4286_s3 = inlined_call_operand.vmem [shape: f32[2,2], index: 3, kind: input, shape index: {}]   ;;  %s4287_s4 = inlined_call_operand.vmem [shape: f32[2,4,32,8], index: 4, kind: input, shape index: {}]   ;;  %s4288_s5 = inlined_call_operand.vmem [shape: f32[2,4,32,8], index: 5, kind: input, shape index: {}]   ;;  %s4289_s6 = inlined_call_operand.vmem [shape: f32[2,4,32,8], index: 6, kind: input, shape index: {}]   ;;  %s4290_s7 = inlined_call_operand.vmem [shape: f32[2,4,8,32], index: 7, kind: input, shape index: {}]   ;;  %s4291_s8 = inlined_call_operand.vmem [shape: f32[2,32,64], index: 8, kind: input, shape index: {}]   ;;  %s4292_s9 = inlined_call_operand.vmem [shape: f32[2,1,64], index: 9, kind: input, shape index: {}]   ;;  %s4293_s10 = inlined_call_operand.vmem [shape: f32[2,64,32], index: 10, kind: input, shape index: {}]   ;;  %s4294_s11 = inlined_call_operand.vmem [shape: f32[2,5,32], index: 11, kind: input, shape index: {}]   ;;  %s4295_s12 = inlined_call_operand.vmem [shape: f32[32,32], index: 12, kind: input, shape index: {}]   ;;  %s4296_s13 = inlined_call_operand.vmem [shape: f32[1,32], index: 13, kind: input, shape index: {}]   ;;  %s4297_s14 = inlined_call_operand.vmem [shape: f32[32,2], index: 14, kind: input, shape index: {}]   ;;  %s4298_s15 = inlined_call_operand.vmem [shape: f32[1,2], index: 15, kind: input, shape index: {}]   ;;  %s4299_s16 = inlined_call_operand.hbm [shape: f32[2,2], index: 16, kind: output, shape index: {0}]   ;;  %s4300_s17 = inlined_call_operand.hbm [shape: f32[1,1], index: 17, kind: output, shape index: {1}]  }
   0x1   :  { %4303 = sst [smem:[#allocation8_spill]] %s4283_s0 }
   0x2   :  { %4304 = sst [smem:[#allocation9_spill]] %s4284_s1 }
   0x3   :  { %23 = vsyncpa [#allocation3], 0  ;;  %v70_v0 = vld [vmem:[%s4287_s4 + $0x18] sm:$0xff]  ;;  %v69_v3 = vld [vmem:[%s4287_s4 + $0x10] sm:$0xff]  ;;  %s4305_s22 = sld [smem:[#allocation8_spill]]  ;;  %vm83_vm0 = vcmask 261120  }
   0x4   :  { %v78_v1 = vld [vmem:[%s4287_s4 + $0x58] sm:$0xff]  ;;  %99 = vmatpush.msra.mxu0 %v70_v0  ;;  %v77_v4 = vld [vmem:[%s4287_s4 + $0x50] sm:$0xff]  ;;  %v68_v6 = vld [vmem:[%s4287_s4 + $0x8] sm:$0xff] }
   0x5   :  { %v82_v2 = vld [vmem:[%s4287_s4 + $0x78] sm:$0xff]  ;;  %139 = vmatpush.msra.mxu2 %v78_v1  ;;  %v81_v5 = vld [vmem:[%s4287_s4 + $0x70] sm:$0xff]  ;;  %v76_v7 = vld [vmem:[%s4287_s4 + $0x48] sm:$0xff] }
   0x6   :  { %159 = vmatpush.msra.mxu3 %v82_v2  ;;  %100 = vmatpush.msra.mxu0 %v69_v3  ;;  %v80_v8 = vld [vmem:[%s4287_s4 + $0x68] sm:$0xff]  ;;  %v67_v9 = vld [vmem:[%s4287_s4] sm:$0xff]  ;;  %v74_v11 = vld [vmem:[%s4287_s4 + $0x38] sm:$0xff] }
   0x7   :  { %140 = vmatpush.msra.mxu2 %v77_v4  ;;  %v75_v10 = vld [vmem:[%s4287_s4 + $0x40] sm:$0xff]  ;;  %119 = vmatpush.msra.mxu1 %v74_v11  ;;  %v73_v14 = vld [vmem:[%s4287_s4 + $0x30] sm:$0xff]  ;;  %v72_v15 = vld [vmem:[%s4287_s4 + $0x28] sm:$0xff] }
   0x8   :  { %160 = vmatpush.msra.mxu3 %v81_v5  ;;  %101 = vmatpush.msra.mxu0 %v68_v6  ;;  %v79_v12 = vld [vmem:[%s4287_s4 + $0x60] sm:$0xff] }
   0x9   :  { %141 = vmatpush.msra.mxu2 %v76_v7  ;;  %v3541_v13 = vld [vmem:[%s4305_s22] sm:$0xff]  ;;  %120 = vmatpush.msra.mxu1 %v73_v14 }
   0xa   :  { %161 = vmatpush.msra.mxu3 %v80_v8  ;;  %102 = vmatpush.msra.mxu0 %v67_v9  ;;  %v71_v16 = vld [vmem:[%s4287_s4 + $0x20] sm:$0xff] }
   0xb   :  { %142 = vmatpush.msra.mxu2 %v75_v10  ;;  %3052 = vmatmul.msk.f32.vlgmr.msra.gmra.mxu0 %vm83_vm0, %v3541_v13 }
   0xc   :  { %162 = vmatpush.msra.mxu3 %v79_v12  ;;  %3054 = vmatmul.msk.f32.vlgmr.msra.gmra.mxu2 %vm83_vm0, %v3541_v13 }
   0xd   :  { %3055 = vmatmul.msk.f32.vlgmr.msra.gmra.mxu3 %vm83_vm0, %v3541_v13  ;;  %182 = vmatpush.msrb.mxu0 %v70_v0 }
   0xe   :  { %222 = vmatpush.msrb.mxu2 %v78_v1  ;;  %242 = vmatpush.msrb.mxu3 %v82_v2 }
   0xf   :  { %183 = vmatpush.msrb.mxu0 %v69_v3 }
  0x10   :  { %223 = vmatpush.msrb.mxu2 %v77_v4 }
  0x11   :  { %24 = vsyncpa [#allocation5], 0  ;;  %243 = vmatpush.msrb.mxu3 %v81_v5  ;;  %121 = vmatpush.msra.mxu1 %v72_v15  ;;  %v3561_v17 = vld [vmem:[%s4305_s22 + $0x8] sm:$0xff]  ;;  %v253_v18 = vld [vmem:[%s4288_s5 + $0x18] sm:$0xff]  ;;  %vm602_vm1 = vcmask 64512   ;;  %s4306_s22 = sld [smem:[#allocation9_spill]] }
  0x12   :  { %184 = vmatpush.msrb.mxu0 %v68_v6  ;;  %224 = vmatpush.msrb.mxu2 %v76_v7  ;;  %v261_v19 = vld [vmem:[%s4288_s5 + $0x58] sm:$0xff]  ;;  %v252_v21 = vld [vmem:[%s4288_s5 + $0x10] sm:$0xff]  ;;  %v251_v24 = vld [vmem:[%s4288_s5 + $0x8] sm:$0xff]  ;;  %vm1401_vm9 = vcmask 523264   ;;  %s3038_s1 = sshll.u32 %s4300_s17, 4  ;;  %s3039_s1 = int_to_ptr.hbm [resolvable:$true] %s3038_s1 }
  0x13   :  { %244 = vmatpush.msrb.mxu3 %v80_v8  ;;  %122 = vmatpush.msra.mxu1 %v71_v16  ;;  %v265_v20 = vld [vmem:[%s4288_s5 + $0x78] sm:$0xff]  ;;  %v260_v22 = vld [vmem:[%s4288_s5 + $0x50] sm:$0xff]  ;;  %v259_v25 = vld [vmem:[%s4288_s5 + $0x48] sm:$0xff] }
  0x14   :  { %185 = vmatpush.msrb.mxu0 %v67_v9  ;;  %225 = vmatpush.msrb.mxu2 %v75_v10  ;;  %v264_v23 = vld [vmem:[%s4288_s5 + $0x70] sm:$0xff]  ;;  %v263_v26 = vld [vmem:[%s4288_s5 + $0x68] sm:$0xff]  ;;  %v250_v27 = vld [vmem:[%s4288_s5] sm:$0xff] }
  0x15   :  { %245 = vmatpush.msrb.mxu3 %v79_v12  ;;  %3053 = vmatmul.msk.f32.vlgmr.msra.gmra.mxu1 %vm83_vm0, %v3541_v13  ;;  %v258_v28 = vld [vmem:[%s4288_s5 + $0x40] sm:$0xff]  ;;  %v257_v30 = vld [vmem:[%s4288_s5 + $0x38] sm:$0xff]  ;;  %v256_v31 = vld [vmem:[%s4288_s5 + $0x30] sm:$0xff] }
  0x16   :  { %3056 = vmatmul.msk.f32.vlgmr.msrb.gmra.mxu0 %vm83_vm0, %v3561_v17  ;;  %3058 = vmatmul.msk.f32.vlgmr.msrb.gmra.mxu2 %vm83_vm0, %v3561_v17  ;;  %v262_v29 = vld [vmem:[%s4288_s5 + $0x60] sm:$0xff]  ;;  %v255_v32 = vld [vmem:[%s4288_s5 + $0x28] sm:$0xff]  ;;  %v429_v34 = vld [vmem:[%s4289_s6 + $0x18] sm:$0xff] }
  0x17   :  { %3059 = vmatmul.msk.f32.vlgmr.msrb.gmra.mxu3 %vm83_vm0, %v3561_v17  ;;  %202 = vmatpush.msrb.mxu1 %v74_v11  ;;  %v254_v33 = vld [vmem:[%s4288_s5 + $0x20] sm:$0xff]  ;;  %v428_v35 = vld [vmem:[%s4289_s6 + $0x10] sm:$0xff]  ;;  %v427_v36 = vld [vmem:[%s4289_s6 + $0x8] sm:$0xff] }
  0x18   :  { %278 = vmatpush.msra.mxu0 %v253_v18  ;;  %318 = vmatpush.msra.mxu2 %v261_v19  ;;  %v426_v37 = vld [vmem:[%s4289_s6] sm:$0xff]  ;;  %v437_v38 = vld [vmem:[%s4289_s6 + $0x58] sm:$0xff]  ;;  %v436_v41 = vld [vmem:[%s4289_s6 + $0x50] sm:$0xff] }
  0x19   :  { %338 = vmatpush.msra.mxu3 %v265_v20  ;;  %203 = vmatpush.msrb.mxu1 %v73_v14  ;;  %v441_v39 = vld [vmem:[%s4289_s6 + $0x78] sm:$0xff]  ;;  %v440_v42 = vld [vmem:[%s4289_s6 + $0x70] sm:$0xff]  ;;  %v435_v44 = vld [vmem:[%s4289_s6 + $0x48] sm:$0xff] }
  0x1a   :  { %279 = vmatpush.msra.mxu0 %v252_v21  ;;  %319 = vmatpush.msra.mxu2 %v260_v22  ;;  %v433_v40 = vld [vmem:[%s4289_s6 + $0x38] sm:$0xff]  ;;  %v432_v43 = vld [vmem:[%s4289_s6 + $0x30] sm:$0xff]  ;;  %v439_v45 = vld [vmem:[%s4289_s6 + $0x68] sm:$0xff] }
  0x1b   :  { %339 = vmatpush.msra.mxu3 %v264_v23  ;;  %204 = vmatpush.msrb.mxu1 %v72_v15  ;;  %v431_v46 = vld [vmem:[%s4289_s6 + $0x28] sm:$0xff]  ;;  %v434_v47 = vld [vmem:[%s4289_s6 + $0x40] sm:$0xff] }
  0x1c   :  { %280 = vmatpush.msra.mxu0 %v251_v24  ;;  %320 = vmatpush.msra.mxu2 %v259_v25  ;;  %v438_v48 = vld [vmem:[%s4289_s6 + $0x60] sm:$0xff]  ;;  %v60_v15 = vld [vmem:[%s4306_s22 + $0x8] sm:$0xff] }
  0x1d   :  { %340 = vmatpush.msra.mxu3 %v263_v26  ;;  %205 = vmatpush.msrb.mxu1 %v71_v16  ;;  %v430_v49 = vld [vmem:[%s4289_s6 + $0x20] sm:$0xff] }
  0x1e   :  { %281 = vmatpush.msra.mxu0 %v250_v27  ;;  %321 = vmatpush.msra.mxu2 %v258_v28  ;;  %v59_v10 = vld [vmem:[%s4306_s22] sm:$0xff] }
  0x1f   :  { %341 = vmatpush.msra.mxu3 %v262_v29  ;;  %3057 = vmatmul.msk.f32.vlgmr.msrb.gmra.mxu1 %vm83_vm0, %v3561_v17 }
  0x20   :  { %3060 = vmatmul.msk.f32.vlgmr.msra.gmra.mxu0 %vm83_vm0, %v3541_v13  ;;  %3062 = vmatmul.msk.f32.vlgmr.msra.gmra.mxu2 %vm83_vm0, %v3541_v13 }
  0x21   :  { %3063 = vmatmul.msk.f32.vlgmr.msra.gmra.mxu3 %vm83_vm0, %v3541_v13  ;;  %298 = vmatpush.msra.mxu1 %v257_v30 }
  0x22   :  { %398 = vmatpush.msrb.mxu2 %v261_v19  ;;  %418 = vmatpush.msrb.mxu3 %v265_v20  ;;  %v61_v19 = vld [vmem:[%s4306_s22 + $0x10] sm:$0xff] }
  0x23   :  { %358 = vmatpush.msrb.mxu0 %v253_v18  ;;  %299 = vmatpush.msra.mxu1 %v256_v31 }
  0x24   :  { %399 = vmatpush.msrb.mxu2 %v260_v22  ;;  %419 = vmatpush.msrb.mxu3 %v264_v23 }
  0x25   :  { %359 = vmatpush.msrb.mxu0 %v252_v21  ;;  %300 = vmatpush.msra.mxu1 %v255_v32 }
  0x26   :  { %400 = vmatpush.msrb.mxu2 %v259_v25  ;;  %420 = vmatpush.msrb.mxu3 %v263_v26  ;;  %v64_v26 = vld [vmem:[%s4306_s22 + $0x28] sm:$0xff] }
  0x27   :  { %360 = vmatpush.msrb.mxu0 %v251_v24  ;;  %301 = vmatpush.msra.mxu1 %v254_v33  ;;  %v62_v24 = vld [vmem:[%s4306_s22 + $0x18] sm:$0xff] }
  0x28   :  { %401 = vmatpush.msrb.mxu2 %v258_v28  ;;  %421 = vmatpush.msrb.mxu3 %v262_v29 }
  0x29   :  { %3061 = vmatmul.msk.f32.vlgmr.msra.gmra.mxu1 %vm83_vm0, %v3541_v13  ;;  %361 = vmatpush.msrb.mxu0 %v250_v27 }
  0x2a   :  { %3066 = vmatmul.msk.f32.vlgmr.msrb.gmra.mxu2 %vm83_vm0, %v3561_v17  ;;  %3067 = vmatmul.msk.f32.vlgmr.msrb.gmra.mxu3 %vm83_vm0, %v3561_v17 }
  0x2b   :  { %3064 = vmatmul.msk.f32.vlgmr.msrb.gmra.mxu0 %vm83_vm0, %v3561_v17  ;;  %378 = vmatpush.msrb.mxu1 %v257_v30  ;;  %v65_v30 = vld [vmem:[%s4306_s22 + $0x30] sm:$0xff] }
  0x2c   :  { %454 = vmatpush.msra.mxu0 %v429_v34  ;;  %494 = vmatpush.msra.mxu2 %v437_v38 }
  0x2d   :  { %379 = vmatpush.msrb.mxu1 %v256_v31  ;;  %514 = vmatpush.msra.mxu3 %v441_v39 }
  0x2e   :  { %455 = vmatpush.msra.mxu0 %v428_v35  ;;  %495 = vmatpush.msra.mxu2 %v436_v41 }
  0x2f   :  { %380 = vmatpush.msrb.mxu1 %v255_v32  ;;  %515 = vmatpush.msra.mxu3 %v440_v42 }
  0x30   :  { %456 = vmatpush.msra.mxu0 %v427_v36  ;;  %496 = vmatpush.msra.mxu2 %v435_v44 }
  0x31   :  { %381 = vmatpush.msrb.mxu1 %v254_v33  ;;  %516 = vmatpush.msra.mxu3 %v439_v45 }
  0x32   :  { %3065 = vmatmul.msk.f32.vlgmr.msrb.gmra.mxu1 %vm83_vm0, %v3561_v17  ;;  %457 = vmatpush.msra.mxu0 %v426_v37 }
  0x33   :  { %474 = vmatpush.msra.mxu1 %v433_v40  ;;  %3068 = vmatmul.msk.f32.vlgmr.msra.gmra.mxu0 %vm83_vm0, %v3541_v13 }
  0x34   :  { %534 = vmatpush.msrb.mxu0 %v429_v34  ;;  %497 = vmatpush.msra.mxu2 %v434_v47 }
  0x35   :  { %475 = vmatpush.msra.mxu1 %v432_v43  ;;  %517 = vmatpush.msra.mxu3 %v438_v48 }
  0x36   :  { %535 = vmatpush.msrb.mxu0 %v428_v35  ;;  %3070 = vmatmul.msk.f32.vlgmr.msra.gmra.mxu2 %vm83_vm0, %v3541_v13  ;;  %v63_v35 = vld [vmem:[%s4306_s22 + $0x20] sm:$0xff] }
  0x37   :  { %476 = vmatpush.msra.mxu1 %v431_v46  ;;  %3071 = vmatmul.msk.f32.vlgmr.msra.gmra.mxu3 %vm83_vm0, %v3541_v13 }
  0x38   :  { %536 = vmatpush.msrb.mxu0 %v427_v36  ;;  %574 = vmatpush.msrb.mxu2 %v437_v38  ;;  %v66_v38 = vld [vmem:[%s4306_s22 + $0x38] sm:$0xff] }
  0x39   :  { %477 = vmatpush.msra.mxu1 %v430_v49  ;;  %594 = vmatpush.msrb.mxu3 %v441_v39 }
  0x3a   :  { %537 = vmatpush.msrb.mxu0 %v426_v37  ;;  %3069 = vmatmul.msk.f32.vlgmr.msra.gmra.mxu1 %vm83_vm0, %v3541_v13 }
  0x3b   :  { %3072 = vmatmul.msk.f32.vlgmr.msrb.gmra.mxu0 %vm83_vm0, %v3561_v17  ;;  %554 = vmatpush.msrb.mxu1 %v433_v40 }
  0x3c   :  { %575 = vmatpush.msrb.mxu2 %v436_v41  ;;  %595 = vmatpush.msrb.mxu3 %v440_v42 }
  0x3d   :  { %555 = vmatpush.msrb.mxu1 %v432_v43 }
  0x3e   :  { %576 = vmatpush.msrb.mxu2 %v435_v44  ;;  %596 = vmatpush.msrb.mxu3 %v439_v45 }
  0x3f   :  { %556 = vmatpush.msrb.mxu1 %v431_v46 }
  0x40   :  { %577 = vmatpush.msrb.mxu2 %v434_v47  ;;  %597 = vmatpush.msrb.mxu3 %v438_v48 }
  0x41   :  { %3074 = vmatmul.msk.f32.vlgmr.msrb.gmra.mxu2 %vm83_vm0, %v3561_v17  ;;  %3075 = vmatmul.msk.f32.vlgmr.msrb.gmra.mxu3 %vm83_vm0, %v3561_v17 }
  0x42   :  { %557 = vmatpush.msrb.mxu1 %v430_v49 }
  0x43   :  { %3073 = vmatmul.msk.f32.vlgmr.msrb.gmra.mxu1 %vm83_vm0, %v3561_v17 }
  0x88   :  { %v104_v50 = vpop.f32.mrf.mxu0 }
  0x8f   :  { %v144_v51 = vpop.f32.mrf.mxu2 }
  0x90   :  { %v164_v52 = vpop.f32.mrf.mxu3 }
  0x92   :  { %v124_v53 = vpop.f32.mrf.mxu1 }
  0x93   :  { %v187_v54 = vpop.f32.mrf.mxu0 }
  0x99   :  { %v227_v55 = vpop.f32.mrf.mxu2 }
  0x9a   :  { %v247_v56 = vpop.f32.mrf.mxu3 }
  0x9c   :  { %v207_v57 = vpop.f32.mrf.mxu1 }
  0x9d   :  { %v283_v58 = vpop.f32.mrf.mxu0 }
  0x9e   :  { %3076 = vmatpush.xpose.msk.msra.mxu0 %vm602_vm1, %v283_v58 }
  0xa1   :  { %3077 = vmatmul.msk.f32.vlgmr.msra.gmra.mxu0 %vm602_vm1, %v104_v50 }
  0xa3   :  { %v323_v59 = vpop.f32.mrf.mxu2 }
  0xa4   :  { %v343_v60 = vpop.f32.mrf.mxu3  ;;  %3080 = vmatpush.xpose.msk.msra.mxu2 %vm602_vm1, %v323_v59 }
  0xa5   :  { %3082 = vmatpush.xpose.msk.msra.mxu3 %vm602_vm1, %v343_v60 }
  0xa6   :  { %v303_v61 = vpop.f32.mrf.mxu1 }
  0xa7   :  { %3078 = vmatpush.xpose.msk.msra.mxu1 %vm602_vm1, %v303_v61  ;;  %3081 = vmatmul.msk.f32.vlgmr.msra.gmra.mxu2 %vm602_vm1, %v144_v51 }
  0xa8   :  { %v363_v62 = vpop.f32.mrf.mxu0  ;;  %3083 = vmatmul.msk.f32.vlgmr.msra.gmra.mxu3 %vm602_vm1, %v164_v52 }
  0xa9   :  { %3084 = vmatpush.xpose.msk.msrb.mxu0 %vm602_vm1, %v363_v62 }
  0xaa   :  { %3079 = vmatmul.msk.f32.vlgmr.msra.gmra.mxu1 %vm602_vm1, %v124_v53 }
  0xac   :  { %3085 = vmatmul.msk.f32.vlgmr.msrb.gmra.mxu0 %vm602_vm1, %v187_v54 }
  0xad   :  { %v403_v63 = vpop.f32.mrf.mxu2  ;;  %v423_v0 = vpop.f32.mrf.mxu3 }
  0xae   :  { %3088 = vmatpush.xpose.msk.msrb.mxu2 %vm602_vm1, %v403_v63  ;;  %3090 = vmatpush.xpose.msk.msrb.mxu3 %vm602_vm1, %v423_v0 }
  0xaf   :  { %v383_v1 = vpop.f32.mrf.mxu1 }
  0xb0   :  { %3086 = vmatpush.xpose.msk.msrb.mxu1 %vm602_vm1, %v383_v1  ;;  %v459_v2 = vpop.f32.mrf.mxu0 }
  0xb1   :  { %3089 = vmatmul.msk.f32.vlgmr.msrb.gmra.mxu2 %vm602_vm1, %v227_v55  ;;  %3091 = vmatmul.msk.f32.vlgmr.msrb.gmra.mxu3 %vm602_vm1, %v247_v56 }
  0xb2   :  { %917 = vmatpush.msra.mxu0 %v459_v2 }
  0xb3   :  { %3087 = vmatmul.msk.f32.vlgmr.msrb.gmra.mxu1 %vm602_vm1, %v207_v57 }
  0xb7   :  { %v479_v3 = vpop.f32.mrf.mxu1 }
  0xb8   :  { %v539_v4 = vpop.f32.mrf.mxu0  ;;  %940 = vmatpush.msra.mxu1 %v479_v3 }
  0xb9   :  { %1009 = vmatpush.msrb.mxu0 %v539_v4  ;;  %v499_v5 = vpop.f32.mrf.mxu2 }
  0xba   :  { %v519_v6 = vpop.f32.mrf.mxu3  ;;  %963 = vmatpush.msra.mxu2 %v499_v5 }
  0xbb   :  { %986 = vmatpush.msra.mxu3 %v519_v6 }
  0xc0   :  { %v559_v7 = vpop.f32.mrf.mxu1 }
  0xc1   :  { %1032 = vmatpush.msrb.mxu1 %v559_v7 }
  0xc4   :  { %v579_v8 = vpop.f32.mrf.mxu2  ;;  %v599_v9 = vpop.f32.mrf.mxu3 }
  0xc5   :  { %1055 = vmatpush.msrb.mxu2 %v579_v8  ;;  %1078 = vmatpush.msrb.mxu3 %v599_v9 }
 0x11e   :  { %v626_v11 = vpop.f32.mrf.mxu0 }
 0x11f   :  { %v627_v12 = vadd.f32 %v626_v11, %v59_v10 }
 0x121   :  { %v811_v14 = vsel %vm602_vm1, %v627_v12, -inf }
 0x122   :  { %812 = vmax.xlane.f32.xlu1 %v811_v14 }
 0x127   :  { %v652_v16 = vpop.f32.mrf.mxu1 }
 0x128   :  { %v653_v18 = vadd.f32 %v652_v16, %v60_v15 }
 0x129   :  { %v730_v36 = vpop.f32.mrf.mxu0 }
 0x12a   :  { %v678_v20 = vpop.f32.mrf.mxu2  ;;  %v814_v21 = vsel %vm602_vm1, %v653_v18, -inf  ;;  %v731_v40 = vadd.f32 %v730_v36, %v63_v35 }
 0x12b   :  { %v679_v22 = vadd.f32 %v678_v20, %v61_v19  ;;  %815 = vmax.xlane.f32.xlu1 %v814_v21  ;;  %v704_v25 = vpop.f32.mrf.mxu3 }
 0x12c   :  { %v705_v28 = vadd.f32 %v704_v25, %v62_v24  ;;  %v823_v42 = vsel %vm602_vm1, %v731_v40, -inf }
 0x12d   :  { %v817_v23 = vsel %vm602_vm1, %v679_v22, -inf }
 0x12e   :  { %818 = vmax.xlane.f32.xlu0 %v817_v23  ;;  %v820_v34 = vsel %vm602_vm1, %v705_v28, -inf }
 0x130   :  { %v756_v27 = vpop.f32.mrf.mxu1 }
 0x131   :  { %v757_v29 = vadd.f32 %v756_v27, %v64_v26 }
 0x133   :  { %v826_v31 = vsel %vm602_vm1, %v757_v29, -inf }
 0x134   :  { %v782_v32 = vpop.f32.mrf.mxu2  ;;  %827 = vmax.xlane.f32.xlu1 %v826_v31  ;;  %v808_v39 = vpop.f32.mrf.mxu3 }
 0x135   :  { %v783_v33 = vadd.f32 %v782_v32, %v65_v30  ;;  %v809_v41 = vadd.f32 %v808_v39, %v66_v38 }
 0x136   :  { %821 = vmax.xlane.f32.xlu0 %v820_v34 }
 0x137   :  { %v829_v37 = vsel %vm602_vm1, %v783_v33, -inf  ;;  %v832_v43 = vsel %vm602_vm1, %v809_v41, -inf }
 0x138   :  { %830 = vmax.xlane.f32.xlu2 %v829_v37 }
 0x13e   :  { %824 = vmax.xlane.f32.xlu0 %v823_v42 }
 0x140   :  { %833 = vmax.xlane.f32.xlu2 %v832_v43 }
 0x195   :  { %v813_v44 = vpop.xlane.xlu1 %812 }
 0x196   :  { %v835_v45 = vsub.f32 %v627_v12, %v813_v44 }
 0x198   :  { %v843_v46 = vmul.f32 1.442695, %v835_v45 }
 0x19a   :  { %3250 = vpow2.f32 %v843_v46  ;;  %v1083_v46 = vld [vmem:[%s4290_s7] sm:$0xff] }
 0x19e   :  { %v816_v48 = vpop.xlane.xlu1 %815 }
 0x19f   :  { %v836_v52 = vsub.f32 %v653_v18, %v816_v48  ;;  %v1084_v48 = vld [vmem:[%s4290_s7 + $0x8] sm:$0xff] }
 0x1a0   :  { %v3251_v47 = vpop.eup %3250 }
 0x1a1   :  { %v819_v49 = vpop.xlane.xlu0 %818  ;;  %v859_v50 = vsel %vm602_vm1, %v3251_v47, 0.0  ;;  %v845_v54 = vmul.f32 1.442695, %v836_v52 }
 0x1a2   :  { %v837_v51 = vsub.f32 %v679_v22, %v819_v49  ;;  %860 = vadd.xlane.f32.xlu1 %v859_v50  ;;  %v1086_v49 = vld [vmem:[%s4290_s7 + $0x18] sm:$0xff] }
 0x1a4   :  { %v847_v53 = vmul.f32 1.442695, %v837_v51 }
 0x1a6   :  { %3252 = vpow2.f32 %v847_v53 }
 0x1a7   :  { %3254 = vpow2.f32 %v845_v54  ;;  %v828_v63 = vpop.xlane.xlu1 %827 }
 0x1a8   :  { %v840_v5 = vsub.f32 %v757_v29, %v828_v63 }
 0x1a9   :  { %v822_v55 = vpop.xlane.xlu0 %821 }
 0x1aa   :  { %v838_v56 = vsub.f32 %v705_v28, %v822_v55  ;;  %v853_v11 = vmul.f32 1.442695, %v840_v5 }
 0x1ab   :  { %v831_v57 = vpop.xlane.xlu2 %830 }
 0x1ac   :  { %v3253_v58 = vpop.eup %3252  ;;  %v841_v59 = vsub.f32 %v783_v33, %v831_v57  ;;  %v849_v60 = vmul.f32 1.442695, %v838_v56 }
 0x1ad   :  { %v865_v61 = vsel %vm602_vm1, %v3253_v58, 0.0  ;;  %v3255_v1 = vpop.eup %3254 }
 0x1ae   :  { %3256 = vpow2.f32 %v849_v60  ;;  %866 = vadd.xlane.f32.xlu2 %v865_v61  ;;  %v855_v62 = vmul.f32 1.442695, %v841_v59  ;;  %v862_v9 = vsel %vm602_vm1, %v3255_v1, 0.0 }
 0x1b0   :  { %3258 = vpow2.f32 %v855_v62 }
 0x1b1   :  { %v825_v0 = vpop.xlane.xlu0 %824 }
 0x1b2   :  { %v839_v2 = vsub.f32 %v731_v40, %v825_v0 }
 0x1b3   :  { %v834_v3 = vpop.xlane.xlu2 %833 }
 0x1b4   :  { %v3257_v4 = vpop.eup %3256  ;;  %v842_v6 = vsub.f32 %v809_v41, %v834_v3  ;;  %v851_v7 = vmul.f32 1.442695, %v839_v2 }
 0x1b5   :  { %v868_v8 = vsel %vm602_vm1, %v3257_v4, 0.0 }
 0x1b6   :  { %v857_v10 = vmul.f32 1.442695, %v842_v6  ;;  %3260 = vpow2.f32 %v851_v7  ;;  %869 = vadd.xlane.f32.xlu0 %v868_v8  ;;  %863 = vadd.xlane.f32.xlu2 %v862_v9  ;;  %v3259_v12 = vpop.eup %3258 }
 0x1b7   :  { %v877_v15 = vsel %vm602_vm1, %v3259_v12, 0.0 }
 0x1b8   :  { %3262 = vpow2.f32 %v857_v10 }
 0x1b9   :  { %3264 = vpow2.f32 %v853_v11 }
 0x1bc   :  { %v3261_v14 = vpop.eup %3260 }
 0x1bd   :  { %v871_v16 = vsel %vm602_vm1, %v3261_v14, 0.0 }
 0x1be   :  { %v3263_v18 = vpop.eup %3262  ;;  %878 = vadd.xlane.f32.xlu0 %v877_v15  ;;  %872 = vadd.xlane.f32.xlu2 %v871_v16 }
 0x1bf   :  { %v880_v19 = vsel %vm602_vm1, %v3263_v18, 0.0  ;;  %v3265_v20 = vpop.eup %3264 }
 0x1c0   :  { %881 = vadd.xlane.f32.xlu1 %v880_v19  ;;  %v874_v21 = vsel %vm602_vm1, %v3265_v20, 0.0 }
 0x1c6   :  { %875 = vadd.xlane.f32.xlu0 %v874_v21 }
 0x215   :  { %v861_v22 = vpop.xlane.xlu1 %860 }
 0x216   :  { %3266 = vrcp.f32 %v861_v22 }
 0x21c   :  { %v3267_v23 = vpop.eup %3266 }
 0x21d   :  { %v891_v24 = vmul.f32 %v3267_v23, %v3251_v47  ;;  %v1085_v47 = vld [vmem:[%s4290_s7 + $0x10] sm:$0xff] }
 0x21f   :  { %3092 = vmatmul.msk.f32.vlgmr.msra.gmra.mxu0 %vm602_vm1, %v891_v24 }
 0x220   :  { %1105 = vmatpush.msra.mxu0 %v1083_v46 }
 0x221   :  { %v867_v25 = vpop.xlane.xlu2 %866 }
 0x222   :  { %3268 = vrcp.f32 %v867_v25 }
 0x228   :  { %v3269_v26 = vpop.eup %3268 }
 0x229   :  { %v893_v27 = vmul.f32 %v3269_v26, %v3253_v58  ;;  %v870_v28 = vpop.xlane.xlu0 %869  ;;  %v864_v29 = vpop.xlane.xlu2 %863 }
 0x22a   :  { %3270 = vrcp.f32 %v870_v28 }
 0x22b   :  { %3272 = vrcp.f32 %v864_v29  ;;  %3094 = vmatmul.msk.f32.vlgmr.msra.gmra.mxu2 %vm602_vm1, %v893_v27  ;;  %v1340_v29 = vld [vmem:[%s4291_s8 + $0x18] sm:$0xff] }
 0x22c   :  { %1151 = vmatpush.msra.mxu2 %v1085_v47 }
 0x230   :  { %v3271_v30 = vpop.eup %3270 }
 0x231   :  { %v3273_v31 = vpop.eup %3272  ;;  %v894_v32 = vmul.f32 %v3271_v30, %v3257_v4  ;;  %v879_v33 = vpop.xlane.xlu0 %878  ;;  %v1339_v30 = vld [vmem:[%s4291_s8 + $0x10] sm:$0xff] }
 0x232   :  { %v873_v34 = vpop.xlane.xlu2 %872  ;;  %v892_v35 = vmul.f32 %v3273_v31, %v3255_v1  ;;  %3274 = vrcp.f32 %v879_v33  ;;  %v1338_v31 = vld [vmem:[%s4291_s8 + $0x8] sm:$0xff] }
 0x233   :  { %3276 = vrcp.f32 %v873_v34  ;;  %v882_v36 = vpop.xlane.xlu1 %881  ;;  %3095 = vmatmul.msk.f32.vlgmr.msra.gmra.mxu3 %vm602_vm1, %v894_v32  ;;  %v1337_v32 = vld [vmem:[%s4291_s8] sm:$0xff] }
 0x234   :  { %3278 = vrcp.f32 %v882_v36  ;;  %3093 = vmatmul.msk.f32.vlgmr.msra.gmra.mxu1 %vm602_vm1, %v892_v35  ;;  %1174 = vmatpush.msra.mxu3 %v1086_v49 }
 0x235   :  { %1128 = vmatpush.msra.mxu1 %v1084_v48 }
 0x238   :  { %v3275_v37 = vpop.eup %3274 }
 0x239   :  { %v3277_v38 = vpop.eup %3276  ;;  %v897_v39 = vmul.f32 %v3275_v37, %v3259_v12  ;;  %v876_v40 = vpop.xlane.xlu0 %875  ;;  %v3406_v12 = vmov 32.0  }
 0x23a   :  { %v3279_v41 = vpop.eup %3278  ;;  %v895_v42 = vmul.f32 %v3277_v38, %v3261_v14  ;;  %3280 = vrcp.f32 %v876_v40 }
 0x23b   :  { %v898_v43 = vmul.f32 %v3279_v41, %v3263_v18  ;;  %3098 = vmatmul.msk.f32.vlgmr.msrb.gmra.mxu2 %vm602_vm1, %v897_v39  ;;  %3282 = vrcp.f32 %v3406_v12 }
 0x23c   :  { %3096 = vmatmul.msk.f32.vlgmr.msrb.gmra.mxu0 %vm602_vm1, %v895_v42  ;;  %1243 = vmatpush.msrb.mxu2 %v1085_v47 }
 0x23d   :  { %3099 = vmatmul.msk.f32.vlgmr.msrb.gmra.mxu3 %vm602_vm1, %v898_v43  ;;  %1197 = vmatpush.msrb.mxu0 %v1083_v46  ;;  %v3812_v43 = vld [vmem:[%s4294_s11] sm:$0x1f] }
 0x23e   :  { %1266 = vmatpush.msrb.mxu3 %v1086_v49  ;;  %v1331_v47 = vperm.slane %v3812_v43, 0 }
 0x240   :  { %v3281_v44 = vpop.eup %3280 }
 0x241   :  { %v896_v45 = vmul.f32 %v3281_v44, %v3265_v20  ;;  %v3283_v14 = vpop.eup %3282 }
 0x242   :  { %v1287_v15 = vmul.f32 32.0, %v3283_v14  ;;  %vm1291_vm2 = vweird.f32 %v3283_v14 }
 0x243   :  { %3097 = vmatmul.msk.f32.vlgmr.msrb.gmra.mxu1 %vm602_vm1, %v896_v45 }
 0x244   :  { %1220 = vmatpush.msrb.mxu1 %v1084_v48 }
 0x29c   :  { %v919_v50 = vpop.f32.mrf.mxu0 }
 0x29d   :  { %3100 = vmatmul.msk.f32.vlgmr.msra.gmra.mxu0 %vm602_vm1, %v919_v50 }
 0x29e   :  { %1363 = vmatpush.msra.mxu0 %v1340_v29 }
 0x2a0   :  { %1364 = vmatpush.msra.mxu0 %v1339_v30  ;;  %v1400_v30 = vperm.slane %v3812_v43, 2 }
 0x2a2   :  { %1365 = vmatpush.msra.mxu0 %v1338_v31 }
 0x2a4   :  { %1366 = vmatpush.msra.mxu0 %v1337_v32 }
 0x2ae   :  { %v965_v51 = vpop.f32.mrf.mxu2 }
 0x2af   :  { %3102 = vmatmul.msk.f32.vlgmr.msra.gmra.mxu2 %vm602_vm1, %v965_v51  ;;  %v1334_v51 = vperm.slane %v3812_v43, 1 }
 0x2b1   :  { %v942_v52 = vpop.f32.mrf.mxu1 }
 0x2b2   :  { %3101 = vmatmul.msk.f32.vlgmr.msra.gmra.mxu1 %vm602_vm1, %v942_v52 }
 0x2b6   :  { %v988_v53 = vpop.f32.mrf.mxu3 }
 0x2b7   :  { %3103 = vmatmul.msk.f32.vlgmr.msra.gmra.mxu3 %vm602_vm1, %v988_v53 }
 0x2b9   :  { %v1011_v54 = vpop.f32.mrf.mxu0 }
 0x2ba   :  { %3104 = vmatmul.msk.f32.vlgmr.msrb.gmra.mxu0 %vm602_vm1, %v1011_v54 }
 0x2be   :  { %v1057_v55 = vpop.f32.mrf.mxu2 }
 0x2bf   :  { %3106 = vmatmul.msk.f32.vlgmr.msrb.gmra.mxu2 %vm602_vm1, %v1057_v55 }
 0x2c0   :  { %v1080_v56 = vpop.f32.mrf.mxu3  ;;  %v1034_v57 = vpop.f32.mrf.mxu1 }
 0x2c1   :  { %3107 = vmatmul.msk.f32.vlgmr.msrb.gmra.mxu3 %vm602_vm1, %v1080_v56  ;;  %3105 = vmatmul.msk.f32.vlgmr.msrb.gmra.mxu1 %vm602_vm1, %v1034_v57 }
 0x31a   :  { %v1107_v59 = vpop.f32.mrf.mxu0 }
 0x32f   :  { %v1130_v58 = vpop.f32.mrf.mxu1 }
 0x330   :  { %v1271_v61 = vadd.f32 %v1130_v58, %v1107_v59 }
 0x332   :  { %v1153_v60 = vpop.f32.mrf.mxu2 }
 0x333   :  { %v1273_v62 = vadd.f32 %v1271_v61, %v1153_v60 }
 0x337   :  { %v1199_v4 = vpop.f32.mrf.mxu0 }
 0x33a   :  { %v1176_v63 = vpop.f32.mrf.mxu3 }
 0x33b   :  { %v1275_v0 = vadd.f32 %v1273_v62, %v1176_v63  ;;  %v1399_v62 = vld [vmem:[%s4293_s10 + $0x38] sm:$0xff]  ;;  %v1398_v63 = vld [vmem:[%s4293_s10 + $0x30] sm:$0xff] }
 0x33c   :  { %1416 = vmatpush.msra.mxu1 %v1399_v62  ;;  %v3123_v62 = vld [vmem:[%s4287_s4 + $0xd8] sm:$0xff] }
 0x33d   :  { %v1278_v1 = vadd.f32 %v1275_v0, %v3541_v13  ;;  %v1288_v13 = vsub.f32 1.0, %v1287_v15  ;;  %v1397_v0 = vld [vmem:[%s4293_s10 + $0x28] sm:$0xff] }
 0x33e   :  { %v1222_v2 = vpop.f32.mrf.mxu1  ;;  %1417 = vmatpush.msra.mxu1 %v1398_v63  ;;  %v3127_v63 = vld [vmem:[%s4287_s4 + $0xf8] sm:$0xff] }
 0x33f   :  { %v1280_v3 = vsel %vm83_vm0, %v1278_v1, 0.0  ;;  %v1272_v5 = vadd.f32 %v1222_v2, %v1199_v4  ;;  %v1289_v16 = vmul.f32 %v3283_v14, %v1288_v13  ;;  %v1395_v2 = vld [vmem:[%s4293_s10 + $0x18] sm:$0xff]  ;;  %v1393_v4 = vld [vmem:[%s4293_s10 + $0x8] sm:$0xff] }
 0x340   :  { %1281 = vadd.xlane.f32.xlu1 %v1280_v3  ;;  %1418 = vmatpush.msra.mxu1 %v1397_v0  ;;  %v1394_v3 = vld [vmem:[%s4293_s10 + $0x10] sm:$0xff] }
 0x341   :  { %v1290_v18 = vadd.f32 %v3283_v14, %v1289_v16 }
 0x342   :  { %v1245_v6 = vpop.f32.mrf.mxu2 }
 0x343   :  { %v1274_v7 = vadd.f32 %v1272_v5, %v1245_v6  ;;  %v3789_v19 = vsel %vm1291_vm2, %v3283_v14, %v1290_v18  ;;  %v1392_v5 = vld [vmem:[%s4293_s10] sm:$0xff] }
 0x344   :  { %v1268_v8 = vpop.f32.mrf.mxu3  ;;  %v3246_v6 = vld [vmem:[%s4292_s9] ss:$0 sm:$0xff] }
 0x345   :  { %v1276_v9 = vadd.f32 %v1274_v7, %v1268_v8 }
 0x347   :  { %v1279_v10 = vadd.f32 %v1276_v9, %v3561_v17 }
 0x349   :  { %v1283_v11 = vsel %vm83_vm0, %v1279_v10, 0.0 }
 0x34a   :  { %1284 = vadd.xlane.f32.xlu2 %v1283_v11 }
 0x3b3   :  { %v1282_v20 = vpop.xlane.xlu1 %1281 }
 0x3b4   :  { %v1293_v21 = vmul.f32 %v3789_v19, %v1282_v20 }
 0x3b6   :  { %v1295_v22 = vsub.f32 %v1278_v1, %v1293_v21  ;;  %v1396_v1 = vld [vmem:[%s4293_s10 + $0x20] sm:$0xff] }
 0x3b7   :  { %1419 = vmatpush.msra.mxu1 %v1396_v1 }
 0x3b8   :  { %v1297_v23 = vmul.f32 %v1295_v22, %v1295_v22 }
 0x3b9   :  { %1420 = vmatpush.msra.mxu1 %v1395_v2  ;;  %v3122_v2 = vld [vmem:[%s4287_s4 + $0xd0] sm:$0xff] }
 0x3ba   :  { %v1299_v17 = vsel %vm83_vm0, %v1297_v23, 0.0 }
 0x3bb   :  { %1300 = vadd.xlane.f32.xlu0 %v1299_v17  ;;  %1421 = vmatpush.msra.mxu1 %v1394_v3  ;;  %v3126_v3 = vld [vmem:[%s4287_s4 + $0xf0] sm:$0xff] }
 0x3bd   :  { %v1285_v24 = vpop.xlane.xlu2 %1284  ;;  %1422 = vmatpush.msra.mxu1 %v1393_v4 }
 0x3be   :  { %v1294_v25 = vmul.f32 %v3789_v19, %v1285_v24 }
 0x3bf   :  { %1423 = vmatpush.msra.mxu1 %v1392_v5  ;;  %v3121_v5 = vld [vmem:[%s4287_s4 + $0xc8] sm:$0xff] }
 0x3c0   :  { %v1296_v26 = vsub.f32 %v1279_v10, %v1294_v25 }
 0x3c2   :  { %v1298_v27 = vmul.f32 %v1296_v26, %v1296_v26 }
 0x3c4   :  { %v1302_v28 = vsel %vm83_vm0, %v1298_v27, 0.0 }
 0x3c5   :  { %1303 = vadd.xlane.f32.xlu1 %v1302_v28 }
 0x42e   :  { %v1301_v33 = vpop.xlane.xlu0 %1300 }
 0x42f   :  { %v1305_v34 = vmul.f32 %v1301_v33, %v3789_v19 }
 0x431   :  { %v1307_v35 = vadd.f32 1e-12, %v1305_v34 }
 0x433   :  { %3284 = vrsqrt.f32 %v1307_v35  ;;  %vm1315_vm4 = vweird.f32 %v1307_v35 }
 0x438   :  { %v1304_v36 = vpop.xlane.xlu1 %1303 }
 0x439   :  { %v3285_v37 = vpop.eup %3284  ;;  %v1306_v38 = vmul.f32 %v1304_v36, %v3789_v19 }
 0x43a   :  { %v1310_v39 = vmul.f32 %v3285_v37, %v1307_v35  ;;  %vm1316_vm3 = vweird.f32 %v3285_v37 }
 0x43b   :  { %v1308_v40 = vadd.f32 1e-12, %v1306_v38  ;;  %vm1317_vm5 = vmor %vm1315_vm4, %vm1316_vm3 }
 0x43c   :  { %v1311_v41 = vmul.f32 %v3285_v37, %v1310_v39 }
 0x43d   :  { %3286 = vrsqrt.f32 %v1308_v40  ;;  %vm1325_vm7 = vweird.f32 %v1308_v40 }
 0x43e   :  { %v1312_v42 = vmul.f32 0.5, %v1311_v41 }
 0x440   :  { %v1313_v44 = vsub.f32 1.5, %v1312_v42 }
 0x442   :  { %v1314_v45 = vmul.f32 %v3285_v37, %v1313_v44 }
 0x443   :  { %v3287_v46 = vpop.eup %3286 }
 0x444   :  { %v1318_v48 = vsel %vm1317_vm5, %v3285_v37, %v1314_v45  ;;  %v1320_v49 = vmul.f32 %v3287_v46, %v1308_v40  ;;  %vm1326_vm6 = vweird.f32 %v3287_v46 }
 0x445   :  { %v1329_v50 = vmul.f32 %v1318_v48, %v1295_v22  ;;  %vm1327_vm8 = vmor %vm1325_vm7, %vm1326_vm6 }
 0x446   :  { %v1321_v52 = vmul.f32 %v3287_v46, %v1320_v49 }
 0x447   :  { %v1332_v53 = vmul.f32 %v1331_v47, %v1329_v50  ;;  %v3115_v50 = vld [vmem:[%s4287_s4 + $0x98] sm:$0xff] }
 0x448   :  { %v1322_v54 = vmul.f32 0.5, %v1321_v52  ;;  %v3139_v52 = vld [vmem:[%s4288_s5 + $0x98] sm:$0xff]  ;;  %1515 = vmatpush.msra.mxu2 %v3115_v50  ;;  %1598 = vmatpush.msrb.mxu0 %v3115_v50  ;;  %v3148_v50 = vld [vmem:[%s4288_s5 + $0xe0] sm:$0xff] }
 0x449   :  { %v1335_v55 = vadd.f32 %v1334_v51, %v1332_v53  ;;  %1695 = vmatpush.msrb.mxu1 %v3139_v52  ;;  %v3114_v53 = vld [vmem:[%s4287_s4 + $0x90] sm:$0xff] }
 0x44a   :  { %v1323_v56 = vsub.f32 1.5, %v1322_v54  ;;  %v3880_v54 = vld [vmem:[%s4287_s4 + $0xb0] sm:$0xff]  ;;  %1516 = vmatpush.msra.mxu2 %v3114_v53  ;;  %1599 = vmatpush.msrb.mxu0 %v3114_v53 }
 0x44b   :  { %3108 = vmatmul.msk.f32.vlgmr.msra.gmra.mxu0 %vm83_vm0, %v1335_v55  ;;  %v3166_v53 = vld [vmem:[%s4289_s6 + $0xb0] sm:$0xff] }
 0x44c   :  { %v1324_v57 = vmul.f32 %v3287_v46, %v1323_v56  ;;  %v3113_v56 = vld [vmem:[%s4287_s4 + $0x88] sm:$0xff] }
 0x44d   :  { %1517 = vmatpush.msra.mxu2 %v3113_v56  ;;  %1600 = vmatpush.msrb.mxu0 %v3113_v56  ;;  %v3165_v56 = vld [vmem:[%s4289_s6 + $0xa8] sm:$0xff] }
 0x44e   :  { %v1328_v58 = vsel %vm1327_vm8, %v3287_v46, %v1324_v57  ;;  %v3892_v57 = vld [vmem:[%s4287_s4 + $0xa8] sm:$0xff] }
 0x44f   :  { %v1330_v59 = vmul.f32 %v1328_v58, %v1296_v26  ;;  %v3137_v58 = vld [vmem:[%s4288_s5 + $0x88] sm:$0xff] }
 0x451   :  { %v1333_v60 = vmul.f32 %v1331_v47, %v1330_v59  ;;  %v3112_v59 = vld [vmem:[%s4287_s4 + $0x80] sm:$0xff] }
 0x452   :  { %1518 = vmatpush.msra.mxu2 %v3112_v59  ;;  %1601 = vmatpush.msrb.mxu0 %v3112_v59  ;;  %v3164_v59 = vld [vmem:[%s4289_s6 + $0xa0] sm:$0xff] }
 0x453   :  { %v1336_v61 = vadd.f32 %v1334_v51, %v1333_v60  ;;  %v3868_v51 = vld [vmem:[%s4287_s4 + $0xb8] sm:$0xff]  ;;  %v3904_v60 = vld [vmem:[%s4287_s4 + $0xa0] sm:$0xff] }
 0x454   :  { %1535 = vmatpush.msra.mxu3 %v3868_v51  ;;  %1555 = vmatpush.msrb.mxu2 %v3123_v62 }
 0x455   :  { %3109 = vmatmul.msk.f32.gmra.mxu0 %vm83_vm0, %v1336_v61 }
 0x456   :  { %1536 = vmatpush.msra.mxu3 %v3880_v54  ;;  %1658 = vmatpush.msra.mxu0 %v3127_v63 }
 0x457   :  { %1556 = vmatpush.msrb.mxu2 %v3122_v2 }
 0x458   :  { %1537 = vmatpush.msra.mxu3 %v3892_v57  ;;  %1659 = vmatpush.msra.mxu0 %v3126_v3 }
 0x459   :  { %1557 = vmatpush.msrb.mxu2 %v3121_v5 }
 0x45a   :  { %1538 = vmatpush.msra.mxu3 %v3904_v60 }
 0x45c   :  { %1575 = vmatpush.msrb.mxu3 %v3127_v63 }
 0x45e   :  { %1576 = vmatpush.msrb.mxu3 %v3126_v3 }
 0x4c8   :  { %v1368_v7 = vpop.f32.mrf.mxu0 }
 0x4c9   :  { %v1369_v8 = vadd.f32 %v3246_v6, %v1368_v7  ;;  %v3120_v7 = vld [vmem:[%s4287_s4 + $0xc0] sm:$0xff] }
 0x4ca   :  { %1558 = vmatpush.msrb.mxu2 %v3120_v7 }
 0x4cb   :  { %v1374_v9 = vmul.f32 %v1369_v8, %v1369_v8 }
 0x4cd   :  { %v1376_v10 = vmul.f32 %v1374_v9, %v1369_v8 }
 0x4cf   :  { %v1378_v11 = vmul.f32 0.044715, %v1376_v10 }
 0x4d1   :  { %v1380_v12 = vadd.f32 %v1378_v11, %v1369_v8 }
 0x4d2   :  { %v1371_v14 = vpop.f32.mrf.mxu0 }
 0x4d3   :  { %v1382_v15 = vmul.f32 0.7978846, %v1380_v12  ;;  %v1372_v13 = vadd.f32 %v3246_v6, %v1371_v14  ;;  %v3125_v6 = vld [vmem:[%s4287_s4 + $0xe8] sm:$0xff] }
 0x4d4   :  { %1577 = vmatpush.msrb.mxu3 %v3125_v6  ;;  %1660 = vmatpush.msra.mxu0 %v3125_v6 }
 0x4d5   :  { %3288 = vtanh.f32 %v1382_v15  ;;  %v1375_v16 = vmul.f32 %v1372_v13, %v1372_v13 }
 0x4d7   :  { %v1377_v18 = vmul.f32 %v1375_v16, %v1372_v13 }
 0x4d9   :  { %v1379_v20 = vmul.f32 0.044715, %v1377_v18 }
 0x4db   :  { %v3289_v21 = vpop.eup %3288  ;;  %v1381_v22 = vadd.f32 %v1379_v20, %v1372_v13 }
 0x4dc   :  { %v1386_v23 = vadd.f32 1.0, %v3289_v21  ;;  %v1477_v21 = vperm.slane %v3812_v43, 3 }
 0x4dd   :  { %v1383_v17 = vmul.f32 0.7978846, %v1381_v22 }
 0x4de   :  { %v1388_v24 = vmul.f32 0.5, %v1386_v23 }
 0x4df   :  { %3290 = vtanh.f32 %v1383_v17  ;;  %v1480_v17 = vperm.slane %v3812_v43, 4 }
 0x4e0   :  { %v1390_v25 = vmul.f32 %v1388_v24, %v1369_v8  ;;  %v3124_v8 = vld [vmem:[%s4287_s4 + $0xe0] sm:$0xff] }
 0x4e1   :  { %1578 = vmatpush.msrb.mxu3 %v3124_v8  ;;  %1661 = vmatpush.msra.mxu0 %v3124_v8 }
 0x4e2   :  { %3110 = vmatmul.msk.f32.vlgmr.msra.gmra.mxu1 %vm1401_vm9, %v1390_v25 }
 0x4e5   :  { %v3291_v26 = vpop.eup %3290 }
 0x4e6   :  { %v1387_v27 = vadd.f32 1.0, %v3291_v26 }
 0x4e8   :  { %v1389_v28 = vmul.f32 0.5, %v1387_v27 }
 0x4ea   :  { %v1391_v29 = vmul.f32 %v1389_v28, %v1372_v13 }
 0x4ec   :  { %3111 = vmatmul.msk.f32.gmra.mxu1 %vm1401_vm9, %v1391_v29 }
 0x55f   :  { %v1425_v31 = vpop.f32.mrf.mxu1 }
 0x560   :  { %v1426_v32 = vadd.f32 %v1425_v31, %v1400_v30  ;;  %v3162_v31 = vld [vmem:[%s4289_s6 + $0x90] sm:$0xff] }
 0x562   :  { %v1431_v33 = vadd.f32 %v1426_v32, %v1335_v55  ;;  %v3138_v55 = vld [vmem:[%s4288_s5 + $0x90] sm:$0xff] }
 0x563   :  { %1696 = vmatpush.msrb.mxu1 %v3138_v55 }
 0x564   :  { %v1433_v34 = vsel %vm83_vm0, %v1431_v33, 0.0 }
 0x565   :  { %1434 = vadd.xlane.f32.xlu2 %v1433_v34  ;;  %1697 = vmatpush.msrb.mxu1 %v3137_v58 }
 0x569   :  { %v1428_v35 = vpop.f32.mrf.mxu1 }
 0x56a   :  { %v1429_v36 = vadd.f32 %v1428_v35, %v1400_v30  ;;  %v3163_v30 = vld [vmem:[%s4289_s6 + $0x98] sm:$0xff] }
 0x56c   :  { %v1432_v37 = vadd.f32 %v1429_v36, %v1336_v61  ;;  %v3136_v61 = vld [vmem:[%s4288_s5 + $0x80] sm:$0xff]  ;;  %v3143_v36 = vld [vmem:[%s4288_s5 + $0xb8] sm:$0xff] }
 0x56d   :  { %1698 = vmatpush.msrb.mxu1 %v3136_v61 }
 0x56e   :  { %v1436_v38 = vsel %vm83_vm0, %v1432_v37, 0.0 }
 0x56f   :  { %1437 = vadd.xlane.f32.xlu0 %v1436_v38  ;;  %1775 = vmatpush.msra.mxu1 %v3139_v52  ;;  %v3147_v38 = vld [vmem:[%s4288_s5 + $0xd8] sm:$0xff] }
 0x570   :  { %v3171_v52 = vld [vmem:[%s4289_s6 + $0xd8] sm:$0xff] }
 0x571   :  { %1776 = vmatpush.msra.mxu1 %v3138_v55  ;;  %v3175_v55 = vld [vmem:[%s4289_s6 + $0xf8] sm:$0xff] }
 0x573   :  { %1777 = vmatpush.msra.mxu1 %v3137_v58  ;;  %v3174_v58 = vld [vmem:[%s4289_s6 + $0xf0] sm:$0xff] }
 0x575   :  { %1778 = vmatpush.msra.mxu1 %v3136_v61  ;;  %v3173_v61 = vld [vmem:[%s4289_s6 + $0xe8] sm:$0xff] }
 0x5d8   :  { %v1435_v39 = vpop.xlane.xlu2 %1434 }
 0x5d9   :  { %v1439_v40 = vmul.f32 %v1435_v39, %v3789_v19  ;;  %v3160_v39 = vld [vmem:[%s4289_s6 + $0x80] sm:$0xff] }
 0x5db   :  { %v3851_v41 = vsub.f32 %v1431_v33, %v1439_v40  ;;  %v3161_v33 = vld [vmem:[%s4289_s6 + $0x88] sm:$0xff]  ;;  %v3142_v40 = vld [vmem:[%s4288_s5 + $0xb0] sm:$0xff] }
 0x5dd   :  { %v1443_v42 = vmul.f32 %v3851_v41, %v3851_v41 }
 0x5df   :  { %v1445_v44 = vsel %vm83_vm0, %v1443_v42, 0.0  ;;  %v3146_v42 = vld [vmem:[%s4288_s5 + $0xd0] sm:$0xff] }
 0x5e0   :  { %1446 = vadd.xlane.f32.xlu1 %v1445_v44  ;;  %v3141_v44 = vld [vmem:[%s4288_s5 + $0xa8] sm:$0xff] }
 0x5e2   :  { %v1438_v45 = vpop.xlane.xlu0 %1437 }
 0x5e3   :  { %v1440_v46 = vmul.f32 %v1438_v45, %v3789_v19  ;;  %v3150_v45 = vld [vmem:[%s4288_s5 + $0xf0] sm:$0xff] }
 0x5e5   :  { %v3857_v47 = vsub.f32 %v1432_v37, %v1440_v46  ;;  %v3145_v46 = vld [vmem:[%s4288_s5 + $0xc8] sm:$0xff] }
 0x5e7   :  { %v1444_v48 = vmul.f32 %v3857_v47, %v3857_v47 }
 0x5e9   :  { %v1448_v49 = vsel %vm83_vm0, %v1444_v48, 0.0  ;;  %v3144_v48 = vld [vmem:[%s4288_s5 + $0xc0] sm:$0xff] }
 0x5ea   :  { %1449 = vadd.xlane.f32.xlu2 %v1448_v49  ;;  %v3149_v49 = vld [vmem:[%s4288_s5 + $0xe8] sm:$0xff] }
 0x653   :  { %v1447_v0 = vpop.xlane.xlu1 %1446 }
 0x654   :  { %v1451_v1 = vmul.f32 %v1447_v0, %v3789_v19 }
 0x656   :  { %v1453_v4 = vadd.f32 1e-12, %v1451_v1 }
 0x658   :  { %3292 = vrsqrt.f32 %v1453_v4  ;;  %vm1461_vm11 = vweird.f32 %v1453_v4 }
 0x65d   :  { %v1450_v9 = vpop.xlane.xlu2 %1449 }
 0x65e   :  { %v3293_v10 = vpop.eup %3292  ;;  %v1452_v11 = vmul.f32 %v1450_v9, %v3789_v19 }
 0x65f   :  { %v1456_v12 = vmul.f32 %v3293_v10, %v1453_v4  ;;  %vm1462_vm10 = vweird.f32 %v3293_v10 }
 0x660   :  { %v1454_v14 = vadd.f32 1e-12, %v1452_v11  ;;  %vm1463_vm12 = vmor %vm1461_vm11, %vm1462_vm10 }
 0x661   :  { %v1457_v15 = vmul.f32 %v3293_v10, %v1456_v12 }
 0x662   :  { %3294 = vrsqrt.f32 %v1454_v14  ;;  %vm1471_vm14 = vweird.f32 %v1454_v14 }
 0x663   :  { %v1458_v13 = vmul.f32 0.5, %v1457_v15 }
 0x665   :  { %v1459_v16 = vsub.f32 1.5, %v1458_v13 }
 0x667   :  { %v1460_v18 = vmul.f32 %v3293_v10, %v1459_v16 }
 0x668   :  { %v3295_v20 = vpop.eup %3294 }
 0x669   :  { %v1464_v22 = vsel %vm1463_vm12, %v3293_v10, %v1460_v18  ;;  %v1466_v23 = vmul.f32 %v3295_v20, %v1454_v14  ;;  %vm1472_vm13 = vweird.f32 %v3295_v20 }
 0x66a   :  { %v1475_v24 = vmul.f32 %v1464_v22, %v3851_v41  ;;  %vm1473_vm15 = vmor %vm1471_vm14, %vm1472_vm13  ;;  %v3151_v41 = vld [vmem:[%s4288_s5 + $0xf8] sm:$0xff]  ;;  %vm2898_vm13 = vcmask 130048   ;;  %vm2985_vm14 = vcmask 9216  }
 0x66b   :  { %v1467_v25 = vmul.f32 %v3295_v20, %v1466_v23 }
 0x66c   :  { %v1478_v26 = vmul.f32 %v1477_v21, %v1475_v24 }
 0x66d   :  { %v1468_v27 = vmul.f32 0.5, %v1467_v25 }
 0x66e   :  { %v3939_v28 = vadd.f32 %v1480_v17, %v1478_v26  ;;  %v3346_v26 = vld [vmem:[%s4306_s22 + $0x8] sm:$0xff] }
 0x66f   :  { %v1469_v29 = vsub.f32 1.5, %v1468_v27 }
 0x670   :  { %3128 = vmatmul.msk.f32.vlgmr.msra.gmra.mxu2 %vm83_vm0, %v3939_v28  ;;  %3129 = vmatmul.msk.f32.vlgmr.msra.gmra.mxu3 %vm83_vm0, %v3939_v28 }
 0x671   :  { %v1470_v43 = vmul.f32 %v3295_v20, %v1469_v29  ;;  %3152 = vmatmul.msk.f32.vlgmr.msrb.gmra.mxu1 %vm83_vm0, %v3939_v28  ;;  %1618 = vmatpush.msra.mxu2 %v3868_v51  ;;  %v3167_v51 = vld [vmem:[%s4289_s6 + $0xb8] sm:$0xff]  ;;  %v3347_v29 = vld [vmem:[%s4306_s22 + $0x10] sm:$0xff] }
 0x672   :  { %1638 = vmatpush.msra.mxu3 %v3123_v62  ;;  %1872 = vmatpush.msrb.mxu1 %v3163_v30  ;;  %v3172_v62 = vld [vmem:[%s4289_s6 + $0xe0] sm:$0xff] }
 0x673   :  { %v1474_v32 = vsel %vm1473_vm15, %v3295_v20, %v1470_v43  ;;  %1619 = vmatpush.msra.mxu2 %v3880_v54  ;;  %v3170_v54 = vld [vmem:[%s4289_s6 + $0xd0] sm:$0xff]  ;;  %vm3018_vm15 = vcmask 0  }
 0x674   :  { %v1476_v34 = vmul.f32 %v1474_v32, %v3857_v47  ;;  %1639 = vmatpush.msra.mxu3 %v3122_v2  ;;  %1873 = vmatpush.msrb.mxu1 %v3162_v31  ;;  %v3140_v47 = vld [vmem:[%s4288_s5 + $0xa0] sm:$0xff] }
 0x675   :  { %1620 = vmatpush.msra.mxu2 %v3892_v57  ;;  %v3169_v57 = vld [vmem:[%s4289_s6 + $0xc8] sm:$0xff] }
 0x676   :  { %v1479_v35 = vmul.f32 %v1477_v21, %v1476_v34  ;;  %1640 = vmatpush.msra.mxu3 %v3121_v5  ;;  %1874 = vmatpush.msrb.mxu1 %v3161_v33  ;;  %v3348_v34 = vld [vmem:[%s4306_s22] sm:$0xff] }
 0x677   :  { %1621 = vmatpush.msra.mxu2 %v3904_v60  ;;  %v3168_v60 = vld [vmem:[%s4289_s6 + $0xc0] sm:$0xff] }
 0x678   :  { %v3964_v37 = vadd.f32 %v1480_v17, %v1479_v35  ;;  %3130 = vmatmul.msk.f32.vlgmr.msrb.gmra.mxu2 %vm83_vm0, %v3939_v28  ;;  %3131 = vmatmul.msk.f32.vlgmr.msrb.gmra.mxu3 %vm83_vm0, %v3939_v28 }
 0x679   :  { %1641 = vmatpush.msra.mxu3 %v3120_v7  ;;  %1715 = vmatpush.msrb.mxu2 %v3143_v36 }
 0x67a   :  { %3132 = vmatmul.msk.f32.vlgmr.msrb.gmra.mxu0 %vm83_vm0, %v3964_v37  ;;  %3156 = vmatmul.msk.f32.vlgmr.msra.gmra.mxu1 %vm83_vm0, %v3964_v37 }
 0x67b   :  { %1735 = vmatpush.msrb.mxu3 %v3147_v38  ;;  %1875 = vmatpush.msrb.mxu1 %v3160_v39 }
 0x67c   :  { %1716 = vmatpush.msrb.mxu2 %v3142_v40  ;;  %1755 = vmatpush.msrb.mxu0 %v3151_v41 }
 0x67d   :  { %1736 = vmatpush.msrb.mxu3 %v3146_v42  ;;  %1952 = vmatpush.msra.mxu1 %v3163_v30 }
 0x67e   :  { %1717 = vmatpush.msrb.mxu2 %v3141_v44  ;;  %1756 = vmatpush.msrb.mxu0 %v3150_v45 }
 0x67f   :  { %1737 = vmatpush.msrb.mxu3 %v3145_v46  ;;  %1953 = vmatpush.msra.mxu1 %v3162_v31 }
 0x680   :  { %3133 = vmatmul.msk.f32.vlgmr.msra.gmra.mxu2 %vm83_vm0, %v3964_v37  ;;  %3134 = vmatmul.msk.f32.vlgmr.msra.gmra.mxu3 %vm83_vm0, %v3964_v37 }
 0x681   :  { %1718 = vmatpush.msrb.mxu2 %v3140_v47  ;;  %1738 = vmatpush.msrb.mxu3 %v3144_v48 }
 0x682   :  { %3135 = vmatmul.msk.f32.vlgmr.msra.gmra.mxu0 %vm83_vm0, %v3964_v37  ;;  %3176 = vmatmul.msk.f32.vlgmr.msrb.gmra.mxu1 %vm83_vm0, %v3939_v28 }
 0x683   :  { %1757 = vmatpush.msrb.mxu0 %v3149_v49  ;;  %1954 = vmatpush.msra.mxu1 %v3161_v33 }
 0x684   :  { %1795 = vmatpush.msra.mxu2 %v3143_v36  ;;  %1815 = vmatpush.msra.mxu3 %v3147_v38 }
 0x685   :  { %1758 = vmatpush.msrb.mxu0 %v3148_v50  ;;  %1955 = vmatpush.msra.mxu1 %v3160_v39  ;;  %v3349_v39 = vld [vmem:[%s4306_s22 + $0x28] sm:$0xff] }
 0x686   :  { %1796 = vmatpush.msra.mxu2 %v3142_v40  ;;  %1816 = vmatpush.msra.mxu3 %v3146_v42 }
 0x687   :  { %1835 = vmatpush.msra.mxu0 %v3151_v41  ;;  %v3350_v41 = vld [vmem:[%s4306_s22 + $0x30] sm:$0xff] }
 0x688   :  { %3153 = vmatmul.msk.f32.vlgmr.msrb.gmra.mxu2 %vm83_vm0, %v3939_v28  ;;  %3154 = vmatmul.msk.f32.vlgmr.msrb.gmra.mxu3 %vm83_vm0, %v3939_v28 }
 0x689   :  { %1797 = vmatpush.msra.mxu2 %v3141_v44  ;;  %1817 = vmatpush.msra.mxu3 %v3145_v46 }
 0x68a   :  { %3155 = vmatmul.msk.f32.vlgmr.msrb.gmra.mxu0 %vm83_vm0, %v3939_v28  ;;  %3180 = vmatmul.msk.f32.vlgmr.msra.gmra.mxu1 %vm83_vm0, %v3964_v37 }
 0x68b   :  { %1836 = vmatpush.msra.mxu0 %v3150_v45  ;;  %1798 = vmatpush.msra.mxu2 %v3140_v47 }
 0x68c   :  { %1818 = vmatpush.msra.mxu3 %v3144_v48 }
 0x68d   :  { %1892 = vmatpush.msrb.mxu2 %v3167_v51  ;;  %1837 = vmatpush.msra.mxu0 %v3149_v49  ;;  %v3351_v49 = vld [vmem:[%s4306_s22 + $0x18] sm:$0xff] }
 0x68e   :  { %1912 = vmatpush.msrb.mxu3 %v3171_v52 }
 0x68f   :  { %1893 = vmatpush.msrb.mxu2 %v3166_v53  ;;  %1838 = vmatpush.msra.mxu0 %v3148_v50 }
 0x690   :  { %1913 = vmatpush.msrb.mxu3 %v3170_v54  ;;  %3157 = vmatmul.msk.f32.vlgmr.msra.gmra.mxu2 %vm83_vm0, %v3964_v37 }
 0x691   :  { %3158 = vmatmul.msk.f32.vlgmr.msra.gmra.mxu3 %vm83_vm0, %v3964_v37  ;;  %1932 = vmatpush.msrb.mxu0 %v3175_v55 }
 0x692   :  { %1894 = vmatpush.msrb.mxu2 %v3165_v56  ;;  %3159 = vmatmul.msk.f32.vlgmr.msra.gmra.mxu0 %vm83_vm0, %v3964_v37 }
 0x693   :  { %1914 = vmatpush.msrb.mxu3 %v3169_v57  ;;  %1933 = vmatpush.msrb.mxu0 %v3174_v58 }
 0x694   :  { %1895 = vmatpush.msrb.mxu2 %v3164_v59 }
 0x695   :  { %1915 = vmatpush.msrb.mxu3 %v3168_v60  ;;  %1934 = vmatpush.msrb.mxu0 %v3173_v61 }
 0x696   :  { %1972 = vmatpush.msra.mxu2 %v3167_v51  ;;  %v3352_v51 = vld [vmem:[%s4306_s22 + $0x38] sm:$0xff] }
 0x697   :  { %1992 = vmatpush.msra.mxu3 %v3171_v52  ;;  %1935 = vmatpush.msrb.mxu0 %v3172_v62 }
 0x698   :  { %1973 = vmatpush.msra.mxu2 %v3166_v53  ;;  %v3353_v53 = vld [vmem:[%s4306_s22 + $0x20] sm:$0xff] }
 0x699   :  { %1993 = vmatpush.msra.mxu3 %v3170_v54  ;;  %3177 = vmatmul.msk.f32.vlgmr.msrb.gmra.mxu2 %vm83_vm0, %v3939_v28 }
 0x69a   :  { %3178 = vmatmul.msk.f32.vlgmr.msrb.gmra.mxu3 %vm83_vm0, %v3939_v28  ;;  %2012 = vmatpush.msra.mxu0 %v3175_v55 }
 0x69b   :  { %1974 = vmatpush.msra.mxu2 %v3165_v56  ;;  %3179 = vmatmul.msk.f32.vlgmr.msrb.gmra.mxu0 %vm83_vm0, %v3939_v28 }
 0x69c   :  { %1994 = vmatpush.msra.mxu3 %v3169_v57  ;;  %2013 = vmatpush.msra.mxu0 %v3174_v58 }
 0x69d   :  { %1975 = vmatpush.msra.mxu2 %v3164_v59 }
 0x69e   :  { %1995 = vmatpush.msra.mxu3 %v3168_v60  ;;  %2014 = vmatpush.msra.mxu0 %v3173_v61 }
 0x6a0   :  { %2015 = vmatpush.msra.mxu0 %v3172_v62 }
 0x6a1   :  { %3181 = vmatmul.msk.f32.vlgmr.msra.gmra.mxu2 %vm83_vm0, %v3964_v37 }
 0x6a2   :  { %3182 = vmatmul.msk.f32.vlgmr.msra.gmra.mxu3 %vm83_vm0, %v3964_v37 }
 0x6a3   :  { %3183 = vmatmul.msk.f32.vlgmr.msra.gmra.mxu0 %vm83_vm0, %v3964_v37 }
 0x6ee   :  { %v1700_v63 = vpop.f32.mrf.mxu1 }
 0x6ef   :  { %3184 = vmatpush.xpose.msk.msrb.mxu1 %vm602_vm1, %v1700_v63 }
 0x6f3   :  { %v1520_v0 = vpop.f32.mrf.mxu2  ;;  %v1540_v1 = vpop.f32.mrf.mxu3 }
 0x6f4   :  { %3185 = vmatmul.msk.f32.vlgmr.msrb.gmra.mxu1 %vm602_vm1, %v1520_v0 }
 0x6f7   :  { %v1603_v2 = vpop.f32.mrf.mxu0  ;;  %v1780_v3 = vpop.f32.mrf.mxu1 }
 0x6f8   :  { %3192 = vmatpush.xpose.msk.msra.mxu1 %vm602_vm1, %v1780_v3 }
 0x6fb   :  { %v1560_v4 = vpop.f32.mrf.mxu2  ;;  %v1580_v5 = vpop.f32.mrf.mxu3 }
 0x6fc   :  { %3193 = vmatmul.msk.f32.vlgmr.msra.gmra.mxu1 %vm602_vm1, %v1603_v2 }
 0x6ff   :  { %v1663_v6 = vpop.f32.mrf.mxu0  ;;  %v1877_v7 = vpop.f32.mrf.mxu1 }
 0x700   :  { %2334 = vmatpush.msrb.mxu1 %v1877_v7 }
 0x703   :  { %v1623_v8 = vpop.f32.mrf.mxu2  ;;  %v1643_v9 = vpop.f32.mrf.mxu3 }
 0x707   :  { %v1760_v10 = vpop.f32.mrf.mxu0  ;;  %v1957_v11 = vpop.f32.mrf.mxu1 }
 0x708   :  { %3190 = vmatpush.xpose.msk.msrb.mxu0 %vm602_vm1, %v1760_v10  ;;  %2426 = vmatpush.msra.mxu1 %v1957_v11 }
 0x70b   :  { %v1720_v12 = vpop.f32.mrf.mxu2  ;;  %v1740_v14 = vpop.f32.mrf.mxu3  ;;  %3191 = vmatmul.msk.f32.vlgmr.msrb.gmra.mxu0 %vm602_vm1, %v1580_v5 }
 0x70c   :  { %3186 = vmatpush.xpose.msk.msrb.mxu2 %vm602_vm1, %v1720_v12  ;;  %3188 = vmatpush.xpose.msk.msrb.mxu3 %vm602_vm1, %v1740_v14 }
 0x70f   :  { %v1840_v15 = vpop.f32.mrf.mxu0  ;;  %3187 = vmatmul.msk.f32.vlgmr.msrb.gmra.mxu2 %vm602_vm1, %v1540_v1  ;;  %3189 = vmatmul.msk.f32.vlgmr.msrb.gmra.mxu3 %vm602_vm1, %v1560_v4 }
 0x710   :  { %3198 = vmatpush.xpose.msk.msra.mxu0 %vm602_vm1, %v1840_v15 }
 0x713   :  { %v1800_v13 = vpop.f32.mrf.mxu2  ;;  %3199 = vmatmul.msk.f32.vlgmr.msra.gmra.mxu0 %vm602_vm1, %v1663_v6 }
 0x714   :  { %v1820_v16 = vpop.f32.mrf.mxu3  ;;  %3194 = vmatpush.xpose.msk.msra.mxu2 %vm602_vm1, %v1800_v13 }
 0x715   :  { %3196 = vmatpush.xpose.msk.msra.mxu3 %vm602_vm1, %v1820_v16 }
 0x717   :  { %3195 = vmatmul.msk.f32.vlgmr.msra.gmra.mxu2 %vm602_vm1, %v1623_v8 }
 0x718   :  { %v1937_v18 = vpop.f32.mrf.mxu0  ;;  %3197 = vmatmul.msk.f32.vlgmr.msra.gmra.mxu3 %vm602_vm1, %v1643_v9 }
 0x719   :  { %2403 = vmatpush.msrb.mxu0 %v1937_v18 }
 0x71c   :  { %v1897_v20 = vpop.f32.mrf.mxu2 }
 0x71d   :  { %v1917_v21 = vpop.f32.mrf.mxu3  ;;  %2357 = vmatpush.msrb.mxu2 %v1897_v20 }
 0x71e   :  { %2380 = vmatpush.msrb.mxu3 %v1917_v21 }
 0x720   :  { %v2017_v22 = vpop.f32.mrf.mxu0 }
 0x721   :  { %2495 = vmatpush.msra.mxu0 %v2017_v22 }
 0x724   :  { %v1977_v23 = vpop.f32.mrf.mxu2 }
 0x725   :  { %v1997_v17 = vpop.f32.mrf.mxu3  ;;  %2449 = vmatpush.msra.mxu2 %v1977_v23 }
 0x726   :  { %2472 = vmatpush.msra.mxu3 %v1997_v17 }
 0x771   :  { %v2043_v31 = vpop.f32.mrf.mxu1 }
 0x772   :  { %v2044_v35 = vadd.f32 %v3348_v34, %v2043_v31 }
 0x774   :  { %v2228_v44 = vsel %vm602_vm1, %v2044_v35, -inf }
 0x779   :  { %v2147_v48 = vpop.f32.mrf.mxu1 }
 0x77a   :  { %v2148_v54 = vadd.f32 %v3353_v53, %v2147_v48 }
 0x77c   :  { %v2240_v57 = vsel %vm602_vm1, %v2148_v54, -inf }
 0x788   :  { %v2121_v43 = vpop.f32.mrf.mxu0 }
 0x789   :  { %v2122_v50 = vadd.f32 %v3351_v49, %v2121_v43 }
 0x78b   :  { %v2237_v56 = vsel %vm602_vm1, %v2122_v50, -inf }
 0x790   :  { %v2225_v47 = vpop.f32.mrf.mxu0 }
 0x791   :  { %v2226_v52 = vadd.f32 %v3352_v51, %v2225_v47 }
 0x792   :  { %v2069_v24 = vpop.f32.mrf.mxu2  ;;  %v2095_v25 = vpop.f32.mrf.mxu3 }
 0x793   :  { %v2070_v27 = vadd.f32 %v3346_v26, %v2069_v24  ;;  %v2096_v30 = vadd.f32 %v3347_v29, %v2095_v25  ;;  %v2249_v55 = vsel %vm602_vm1, %v2226_v52, -inf }
 0x795   :  { %v2234_v32 = vsel %vm602_vm1, %v2096_v30, -inf  ;;  %v2231_v33 = vsel %vm602_vm1, %v2070_v27, -inf }
 0x796   :  { %2235 = vmax.xlane.f32.xlu1 %v2234_v32  ;;  %2232 = vmax.xlane.f32.xlu0 %v2231_v33 }
 0x79a   :  { %v2173_v36 = vpop.f32.mrf.mxu2 }
 0x79b   :  { %v2199_v38 = vpop.f32.mrf.mxu3  ;;  %v2174_v40 = vadd.f32 %v3349_v39, %v2173_v36 }
 0x79c   :  { %v2200_v42 = vadd.f32 %v3350_v41, %v2199_v38 }
 0x79d   :  { %v2243_v45 = vsel %vm602_vm1, %v2174_v40, -inf }
 0x79e   :  { %v2246_v46 = vsel %vm602_vm1, %v2200_v42, -inf  ;;  %2229 = vmax.xlane.f32.xlu1 %v2228_v44  ;;  %2244 = vmax.xlane.f32.xlu2 %v2243_v45  ;;  %v3209_v45 = vld [vmem:[%s4290_s7 + $0x28] sm:$0xff] }
 0x79f   :  { %2247 = vmax.xlane.f32.xlu0 %v2246_v46 }
 0x7a6   :  { %2250 = vmax.xlane.f32.xlu1 %v2249_v55  ;;  %2238 = vmax.xlane.f32.xlu2 %v2237_v56 }
 0x7a7   :  { %2241 = vmax.xlane.f32.xlu0 %v2240_v57 }
 0x809   :  { %v2236_v58 = vpop.xlane.xlu1 %2235  ;;  %v2233_v59 = vpop.xlane.xlu0 %2232 }
 0x80a   :  { %v2254_v60 = vsub.f32 %v2096_v30, %v2236_v58  ;;  %v2253_v61 = vsub.f32 %v2070_v27, %v2233_v59 }
 0x80c   :  { %v2264_v62 = vmul.f32 1.442695, %v2254_v60  ;;  %v2262_v63 = vmul.f32 1.442695, %v2253_v61 }
 0x80e   :  { %3296 = vpow2.f32 %v2264_v62  ;;  %v3210_v62 = vld [vmem:[%s4290_s7 + $0x30] sm:$0xff] }
 0x80f   :  { %3298 = vpow2.f32 %v2262_v63  ;;  %v3208_v63 = vld [vmem:[%s4290_s7 + $0x20] sm:$0xff] }
 0x811   :  { %v2230_v0 = vpop.xlane.xlu1 %2229  ;;  %v2245_v1 = vpop.xlane.xlu2 %2244 }
 0x812   :  { %v2252_v2 = vsub.f32 %v2044_v35, %v2230_v0  ;;  %v2257_v3 = vsub.f32 %v2174_v40, %v2245_v1  ;;  %v2248_v4 = vpop.xlane.xlu0 %2247  ;;  %v3211_v0 = vld [vmem:[%s4290_s7 + $0x38] sm:$0xff] }
 0x813   :  { %v2258_v5 = vsub.f32 %v2200_v42, %v2248_v4 }
 0x814   :  { %v3297_v6 = vpop.eup %3296  ;;  %v2260_v7 = vmul.f32 1.442695, %v2252_v2  ;;  %v2270_v8 = vmul.f32 1.442695, %v2257_v3 }
 0x815   :  { %v3299_v9 = vpop.eup %3298  ;;  %v2272_v10 = vmul.f32 1.442695, %v2258_v5  ;;  %v2282_v11 = vsel %vm602_vm1, %v3297_v6, 0.0 }
 0x816   :  { %3300 = vpow2.f32 %v2260_v7  ;;  %2283 = vadd.xlane.f32.xlu0 %v2282_v11  ;;  %v2279_v12 = vsel %vm602_vm1, %v3299_v9, 0.0 }
 0x817   :  { %3302 = vpow2.f32 %v2270_v8  ;;  %2280 = vadd.xlane.f32.xlu2 %v2279_v12 }
 0x818   :  { %3304 = vpow2.f32 %v2272_v10 }
 0x819   :  { %v2251_v14 = vpop.xlane.xlu1 %2250  ;;  %v2239_v15 = vpop.xlane.xlu2 %2238 }
 0x81a   :  { %v2242_v13 = vpop.xlane.xlu0 %2241  ;;  %v2259_v16 = vsub.f32 %v2226_v52, %v2251_v14  ;;  %v2255_v18 = vsub.f32 %v2122_v50, %v2239_v15 }
 0x81b   :  { %v2256_v20 = vsub.f32 %v2148_v54, %v2242_v13 }
 0x81c   :  { %v3301_v21 = vpop.eup %3300  ;;  %v2274_v22 = vmul.f32 1.442695, %v2259_v16  ;;  %v2266_v23 = vmul.f32 1.442695, %v2255_v18 }
 0x81d   :  { %v3303_v17 = vpop.eup %3302  ;;  %v2268_v24 = vmul.f32 1.442695, %v2256_v20  ;;  %v2276_v25 = vsel %vm602_vm1, %v3301_v21, 0.0 }
 0x81e   :  { %v3305_v26 = vpop.eup %3304  ;;  %3306 = vpow2.f32 %v2274_v22  ;;  %2277 = vadd.xlane.f32.xlu0 %v2276_v25  ;;  %v2291_v27 = vsel %vm602_vm1, %v3303_v17, 0.0 }
 0x81f   :  { %3308 = vpow2.f32 %v2268_v24  ;;  %2292 = vadd.xlane.f32.xlu1 %v2291_v27  ;;  %v2294_v29 = vsel %vm602_vm1, %v3305_v26, 0.0 }
 0x820   :  { %3310 = vpow2.f32 %v2266_v23  ;;  %2295 = vadd.xlane.f32.xlu2 %v2294_v29 }
 0x824   :  { %v3307_v30 = vpop.eup %3306 }
 0x825   :  { %v3309_v43 = vpop.eup %3308  ;;  %v2297_v31 = vsel %vm602_vm1, %v3307_v30, 0.0 }
 0x826   :  { %v3311_v32 = vpop.eup %3310  ;;  %2298 = vadd.xlane.f32.xlu0 %v2297_v31  ;;  %v2288_v33 = vsel %vm602_vm1, %v3309_v43, 0.0 }
 0x827   :  { %v2285_v34 = vsel %vm602_vm1, %v3311_v32, 0.0 }
 0x828   :  { %2289 = vadd.xlane.f32.xlu2 %v2288_v33  ;;  %2286 = vadd.xlane.f32.xlu1 %v2285_v34 }
 0x889   :  { %v2284_v35 = vpop.xlane.xlu0 %2283 }
 0x88a   :  { %3312 = vrcp.f32 %v2284_v35  ;;  %v2281_v36 = vpop.xlane.xlu2 %2280 }
 0x88b   :  { %3314 = vrcp.f32 %v2281_v36 }
 0x890   :  { %v3313_v38 = vpop.eup %3312 }
 0x891   :  { %v3315_v39 = vpop.eup %3314  ;;  %v2310_v40 = vmul.f32 %v3313_v38, %v3297_v6  ;;  %v2278_v41 = vpop.xlane.xlu0 %2277  ;;  %v3223_v38 = vld [vmem:[%s4291_s8 + $0x30] sm:$0xff] }
 0x892   :  { %v2309_v42 = vmul.f32 %v3315_v39, %v3299_v9  ;;  %3316 = vrcp.f32 %v2278_v41  ;;  %v2293_v44 = vpop.xlane.xlu1 %2292  ;;  %v3222_v39 = vld [vmem:[%s4291_s8 + $0x28] sm:$0xff] }
 0x893   :  { %3318 = vrcp.f32 %v2293_v44  ;;  %v2296_v46 = vpop.xlane.xlu2 %2295  ;;  %3202 = vmatmul.msk.f32.vlgmr.msrb.gmra.mxu3 %vm602_vm1, %v2310_v40  ;;  %v3221_v40 = vld [vmem:[%s4291_s8 + $0x20] sm:$0xff] }
 0x894   :  { %3320 = vrcp.f32 %v2296_v46  ;;  %3201 = vmatmul.msk.f32.vlgmr.msrb.gmra.mxu2 %vm602_vm1, %v2309_v42  ;;  %2569 = vmatpush.msrb.mxu3 %v3210_v62 }
 0x895   :  { %2546 = vmatpush.msrb.mxu2 %v3209_v45 }
 0x898   :  { %v3317_v47 = vpop.eup %3316 }
 0x899   :  { %v3319_v48 = vpop.eup %3318  ;;  %v2308_v49 = vmul.f32 %v3317_v47, %v3301_v21  ;;  %v2299_v55 = vpop.xlane.xlu0 %2298 }
 0x89a   :  { %v3321_v50 = vpop.eup %3320  ;;  %v2313_v51 = vmul.f32 %v3319_v48, %v3303_v17 }
 0x89b   :  { %v2314_v52 = vmul.f32 %v3321_v50, %v3305_v26  ;;  %v2287_v53 = vpop.xlane.xlu1 %2286  ;;  %v2290_v54 = vpop.xlane.xlu2 %2289  ;;  %3200 = vmatmul.msk.f32.vlgmr.msrb.gmra.mxu1 %vm602_vm1, %v2308_v49 }
 0x89c   :  { %3322 = vrcp.f32 %v2287_v53  ;;  %3205 = vmatmul.msk.f32.vlgmr.msra.gmra.mxu2 %vm602_vm1, %v2313_v51  ;;  %2523 = vmatpush.msrb.mxu1 %v3208_v63 }
 0x89d   :  { %3324 = vrcp.f32 %v2290_v54  ;;  %3206 = vmatmul.msk.f32.vlgmr.msra.gmra.mxu3 %vm602_vm1, %v2314_v52  ;;  %2638 = vmatpush.msra.mxu2 %v3209_v45  ;;  %v4189_v52 = vld [vmem:[%s4294_s11 + $0x8] sm:$0x1f] }
 0x89e   :  { %3326 = vrcp.f32 %v2299_v55  ;;  %2661 = vmatpush.msra.mxu3 %v3210_v62 }
 0x8a2   :  { %v3323_v56 = vpop.eup %3322 }
 0x8a3   :  { %v3325_v57 = vpop.eup %3324  ;;  %v2311_v58 = vmul.f32 %v3323_v56, %v3311_v32 }
 0x8a4   :  { %v2312_v59 = vmul.f32 %v3325_v57, %v3309_v43  ;;  %v3327_v60 = vpop.eup %3326  ;;  %v2743_v57 = vperm.slane %v4189_v52, 0 }
 0x8a5   :  { %3203 = vmatmul.msk.f32.vlgmr.msrb.gmra.mxu0 %vm602_vm1, %v2311_v58  ;;  %v2315_v61 = vmul.f32 %v3327_v60, %v3307_v30  ;;  %v2746_v60 = vperm.slane %v4189_v52, 1 }
 0x8a6   :  { %3204 = vmatmul.msk.f32.vlgmr.msra.gmra.mxu1 %vm602_vm1, %v2312_v59  ;;  %2592 = vmatpush.msrb.mxu0 %v3211_v0 }
 0x8a7   :  { %2615 = vmatpush.msra.mxu1 %v3208_v63 }
 0x8ad   :  { %3207 = vmatmul.msk.f32.vlgmr.msra.gmra.mxu0 %vm602_vm1, %v2315_v61 }
 0x8ae   :  { %2684 = vmatpush.msra.mxu0 %v3211_v0 }
 0x916   :  { %v2382_v1 = vpop.f32.mrf.mxu3 }
 0x917   :  { %v2359_v2 = vpop.f32.mrf.mxu2  ;;  %3214 = vmatmul.msk.f32.vlgmr.msrb.gmra.mxu3 %vm602_vm1, %v2382_v1 }
 0x918   :  { %3213 = vmatmul.msk.f32.vlgmr.msrb.gmra.mxu2 %vm602_vm1, %v2359_v2  ;;  %v2336_v3 = vpop.f32.mrf.mxu1 }
 0x919   :  { %3212 = vmatmul.msk.f32.vlgmr.msrb.gmra.mxu1 %vm602_vm1, %v2336_v3 }
 0x91f   :  { %v2451_v4 = vpop.f32.mrf.mxu2 }
 0x920   :  { %v2474_v5 = vpop.f32.mrf.mxu3  ;;  %3217 = vmatmul.msk.f32.vlgmr.msra.gmra.mxu2 %vm602_vm1, %v2451_v4 }
 0x921   :  { %3218 = vmatmul.msk.f32.vlgmr.msra.gmra.mxu3 %vm602_vm1, %v2474_v5 }
 0x922   :  { %v2405_v6 = vpop.f32.mrf.mxu0 }
 0x923   :  { %v2428_v7 = vpop.f32.mrf.mxu1  ;;  %3215 = vmatmul.msk.f32.vlgmr.msrb.gmra.mxu0 %vm602_vm1, %v2405_v6 }
 0x924   :  { %3216 = vmatmul.msk.f32.vlgmr.msra.gmra.mxu1 %vm602_vm1, %v2428_v7  ;;  %v3235_v7 = vld [vmem:[%s4293_s10 + $0x78] sm:$0xff] }
 0x925   :  { %2830 = vmatpush.msrb.mxu2 %v3235_v7 }
 0x92a   :  { %v2497_v8 = vpop.f32.mrf.mxu0 }
 0x92b   :  { %3219 = vmatmul.msk.f32.vlgmr.msra.gmra.mxu0 %vm602_vm1, %v2497_v8  ;;  %v3234_v8 = vld [vmem:[%s4293_s10 + $0x70] sm:$0xff] }
 0x92c   :  { %2831 = vmatpush.msrb.mxu2 %v3234_v8 }
 0x996   :  { %v2525_v9 = vpop.f32.mrf.mxu1 }
 0x99a   :  { %v2571_v11 = vpop.f32.mrf.mxu3 }
 0x99b   :  { %v2548_v10 = vpop.f32.mrf.mxu2 }
 0x99c   :  { %v2689_v12 = vadd.f32 %v2548_v10, %v2525_v9  ;;  %v3233_v9 = vld [vmem:[%s4293_s10 + $0x68] sm:$0xff]  ;;  %v3232_v10 = vld [vmem:[%s4293_s10 + $0x60] sm:$0xff] }
 0x99d   :  { %2832 = vmatpush.msrb.mxu2 %v3233_v9 }
 0x99e   :  { %v2691_v14 = vadd.f32 %v2689_v12, %v2571_v11  ;;  %v3231_v11 = vld [vmem:[%s4293_s10 + $0x58] sm:$0xff]  ;;  %v3230_v12 = vld [vmem:[%s4293_s10 + $0x50] sm:$0xff] }
 0x99f   :  { %2833 = vmatpush.msrb.mxu2 %v3232_v10 }
 0x9a0   :  { %v2594_v15 = vpop.f32.mrf.mxu0 }
 0x9a1   :  { %v2693_v13 = vadd.f32 %v2691_v14, %v2594_v15  ;;  %v2617_v16 = vpop.f32.mrf.mxu1  ;;  %2834 = vmatpush.msrb.mxu2 %v3231_v11  ;;  %v3229_v14 = vld [vmem:[%s4293_s10 + $0x48] sm:$0xff]  ;;  %v3228_v15 = vld [vmem:[%s4293_s10 + $0x40] sm:$0xff] }
 0x9a3   :  { %v2640_v18 = vpop.f32.mrf.mxu2  ;;  %v2697_v20 = vadd.f32 %v2693_v13, %v3939_v28  ;;  %2835 = vmatpush.msrb.mxu2 %v3230_v12  ;;  %v3247_v13 = vld [vmem:[%s4292_s9 + $0x1] ss:$0 sm:$0xff]  ;;  %s3027_s9 = sshll.u32 %s4299_s16, 4  ;;  %s3028_s9 = int_to_ptr.hbm [resolvable:$true] %s3027_s9 }
 0x9a4   :  { %v2690_v21 = vadd.f32 %v2640_v18, %v2617_v16  ;;  %v2663_v22 = vpop.f32.mrf.mxu3 }
 0x9a5   :  { %v2699_v23 = vsel %vm83_vm0, %v2697_v20, 0.0  ;;  %2836 = vmatpush.msrb.mxu2 %v3229_v14 }
 0x9a6   :  { %v2692_v17 = vadd.f32 %v2690_v21, %v2663_v22  ;;  %2700 = vadd.xlane.f32.xlu1 %v2699_v23 }
 0x9a7   :  { %2837 = vmatpush.msrb.mxu2 %v3228_v15 }
 0x9a8   :  { %v2686_v24 = vpop.f32.mrf.mxu0 }
 0x9a9   :  { %v2694_v25 = vadd.f32 %v2692_v17, %v2686_v24 }
 0x9ab   :  { %v2698_v26 = vadd.f32 %v2694_v25, %v3964_v37  ;;  %v3224_v37 = vld [vmem:[%s4291_s8 + $0x38] sm:$0xff] }
 0x9ac   :  { %2777 = vmatpush.msrb.mxu1 %v3224_v37 }
 0x9ad   :  { %v2702_v27 = vsel %vm83_vm0, %v2698_v26, 0.0 }
 0x9ae   :  { %2703 = vadd.xlane.f32.xlu2 %v2702_v27  ;;  %2778 = vmatpush.msrb.mxu1 %v3223_v38  ;;  %v2815_v38 = vperm.slane %v4189_v52, 2 }
 0x9b0   :  { %2779 = vmatpush.msrb.mxu1 %v3222_v39 }
 0x9b2   :  { %2780 = vmatpush.msrb.mxu1 %v3221_v40 }
 0xa19   :  { %v2701_v29 = vpop.xlane.xlu1 %2700 }
 0xa1a   :  { %v2705_v30 = vmul.f32 %v2701_v29, %v3789_v19 }
 0xa1c   :  { %v2707_v43 = vsub.f32 %v2697_v20, %v2705_v30 }
 0xa1e   :  { %v2709_v31 = vmul.f32 %v2707_v43, %v2707_v43 }
 0xa20   :  { %v2711_v28 = vsel %vm83_vm0, %v2709_v31, 0.0 }
 0xa21   :  { %2712 = vadd.xlane.f32.xlu0 %v2711_v28  ;;  %v2704_v32 = vpop.xlane.xlu2 %2703 }
 0xa22   :  { %v2706_v33 = vmul.f32 %v2704_v32, %v3789_v19 }
 0xa24   :  { %v2708_v34 = vsub.f32 %v2698_v26, %v2706_v33 }
 0xa26   :  { %v2710_v35 = vmul.f32 %v2708_v34, %v2708_v34 }
 0xa28   :  { %v2714_v36 = vsel %vm83_vm0, %v2710_v35, 0.0 }
 0xa29   :  { %2715 = vadd.xlane.f32.xlu1 %v2714_v36 }
 0xa94   :  { %v2713_v41 = vpop.xlane.xlu0 %2712 }
 0xa95   :  { %v2717_v42 = vmul.f32 %v2713_v41, %v3789_v19 }
 0xa97   :  { %v2719_v44 = vadd.f32 1e-12, %v2717_v42 }
 0xa99   :  { %3328 = vrsqrt.f32 %v2719_v44  ;;  %vm2727_vm2 = vweird.f32 %v2719_v44 }
 0xa9c   :  { %v2716_v45 = vpop.xlane.xlu1 %2715 }
 0xa9d   :  { %v2718_v46 = vmul.f32 %v2716_v45, %v3789_v19 }
 0xa9f   :  { %v3329_v47 = vpop.eup %3328  ;;  %v2720_v48 = vadd.f32 1e-12, %v2718_v46 }
 0xaa0   :  { %v2722_v49 = vmul.f32 %v3329_v47, %v2719_v44  ;;  %vm2728_vm1 = vweird.f32 %v3329_v47 }
 0xaa1   :  { %3330 = vrsqrt.f32 %v2720_v48  ;;  %vm2729_vm3 = vmor %vm2727_vm2, %vm2728_vm1  ;;  %vm2737_vm5 = vweird.f32 %v2720_v48 }
 0xaa2   :  { %v2723_v50 = vmul.f32 %v3329_v47, %v2722_v49 }
 0xaa4   :  { %v2724_v51 = vmul.f32 0.5, %v2723_v50 }
 0xaa6   :  { %v2725_v53 = vsub.f32 1.5, %v2724_v51 }
 0xaa7   :  { %v3331_v54 = vpop.eup %3330 }
 0xaa8   :  { %v2726_v55 = vmul.f32 %v3329_v47, %v2725_v53  ;;  %v2732_v56 = vmul.f32 %v3331_v54, %v2720_v48  ;;  %vm2738_vm4 = vweird.f32 %v3331_v54 }
 0xaa9   :  { %vm2739_vm6 = vmor %vm2737_vm5, %vm2738_vm4 }
 0xaaa   :  { %v2730_v58 = vsel %vm2729_vm3, %v3329_v47, %v2726_v55  ;;  %v2733_v59 = vmul.f32 %v3331_v54, %v2732_v56 }
 0xaab   :  { %v2741_v61 = vmul.f32 %v2730_v58, %v2707_v43 }
 0xaac   :  { %v2734_v62 = vmul.f32 0.5, %v2733_v59 }
 0xaad   :  { %v2744_v63 = vmul.f32 %v2743_v57, %v2741_v61 }
 0xaae   :  { %v2735_v0 = vsub.f32 1.5, %v2734_v62 }
 0xaaf   :  { %v2747_v1 = vadd.f32 %v2746_v60, %v2744_v63  ;;  %v2925_v63 = vld [vmem:[%s4295_s12 + $0x18] sm:$0xff] }
 0xab0   :  { %v2736_v2 = vmul.f32 %v3331_v54, %v2735_v0  ;;  %v2924_v0 = vld [vmem:[%s4295_s12 + $0x10] sm:$0xff]  ;;  %2945 = vmatpush.msrb.mxu0 %v2925_v63 }
 0xab1   :  { %3226 = vmatmul.msk.f32.vlgmr.msrb.gmra.mxu1 %vm83_vm0, %v2747_v1 }
 0xab2   :  { %v2740_v3 = vsel %vm2739_vm6, %v3331_v54, %v2736_v2  ;;  %v2923_v2 = vld [vmem:[%s4295_s12 + $0x8] sm:$0xff]  ;;  %2946 = vmatpush.msrb.mxu0 %v2924_v0 }
 0xab3   :  { %v2742_v4 = vmul.f32 %v2740_v3, %v2708_v34 }
 0xab4   :  { %2947 = vmatpush.msrb.mxu0 %v2923_v2 }
 0xab5   :  { %v2745_v5 = vmul.f32 %v2743_v57, %v2742_v4 }
 0xab7   :  { %v2748_v6 = vadd.f32 %v2746_v60, %v2745_v5 }
 0xab9   :  { %3227 = vmatmul.msk.f32.gmra.mxu1 %vm83_vm0, %v2748_v6 }
 0xb2e   :  { %v2782_v16 = vpop.f32.mrf.mxu1 }
 0xb2f   :  { %v2783_v18 = vadd.f32 %v3247_v13, %v2782_v16  ;;  %v2891_v16 = vperm.slane %v4189_v52, 3 }
 0xb31   :  { %v2788_v20 = vmul.f32 %v2783_v18, %v2783_v18 }
 0xb33   :  { %v2790_v21 = vmul.f32 %v2788_v20, %v2783_v18 }
 0xb35   :  { %v2792_v22 = vmul.f32 0.044715, %v2790_v21 }
 0xb36   :  { %v2785_v23 = vpop.f32.mrf.mxu1 }
 0xb37   :  { %v2794_v17 = vadd.f32 %v2792_v22, %v2783_v18  ;;  %v2786_v24 = vadd.f32 %v3247_v13, %v2785_v23  ;;  %v2894_v23 = vperm.slane %v4189_v52, 4  ;;  %v2957_v52 = vld [vmem:[%s4297_s14 + $0x18] sm:$0xff] }
 0xb39   :  { %v2796_v25 = vmul.f32 0.7978846, %v2794_v17  ;;  %v2789_v26 = vmul.f32 %v2786_v24, %v2786_v24 }
 0xb3b   :  { %3332 = vtanh.f32 %v2796_v25  ;;  %v2791_v27 = vmul.f32 %v2789_v26, %v2786_v24  ;;  %v2897_v26 = vld [vmem:[%s4285_s2] sm:$0x3] }
 0xb3d   :  { %v2793_v29 = vmul.f32 0.044715, %v2791_v27  ;;  %v2922_v27 = vld [vmem:[%s4295_s12] sm:$0xff] }
 0xb3e   :  { %2948 = vmatpush.msrb.mxu0 %v2922_v27 }
 0xb3f   :  { %v2795_v30 = vadd.f32 %v2793_v29, %v2786_v24 }
 0xb41   :  { %v3333_v43 = vpop.eup %3332  ;;  %v2797_v31 = vmul.f32 0.7978846, %v2795_v30  ;;  %v2956_v30 = vld [vmem:[%s4297_s14 + $0x10] sm:$0xff] }
 0xb42   :  { %v2800_v28 = vadd.f32 1.0, %v3333_v43  ;;  %v2955_v43 = vld [vmem:[%s4297_s14 + $0x8] sm:$0xff] }
 0xb43   :  { %3334 = vtanh.f32 %v2797_v31  ;;  %v2954_v31 = vld [vmem:[%s4297_s14] sm:$0xff] }
 0xb44   :  { %v2802_v32 = vmul.f32 0.5, %v2800_v28  ;;  %v3248_v28 = vld [vmem:[%s4296_s13] ss:$0 sm:$0xff] }
 0xb46   :  { %v2804_v33 = vmul.f32 %v2802_v32, %v2783_v18 }
 0xb48   :  { %3236 = vmatmul.msk.f32.vlgmr.msrb.gmra.mxu2 %vm1401_vm9, %v2804_v33 }
 0xb49   :  { %v3335_v34 = vpop.eup %3334 }
 0xb4a   :  { %v2801_v35 = vadd.f32 1.0, %v3335_v34 }
 0xb4c   :  { %v2803_v36 = vmul.f32 0.5, %v2801_v35  ;;  %v3249_v35 = vld [vmem:[%s4298_s15] ss:$0 sm:$0xff]  ;;  %s3407_s15 = smov [#allocation2]  }
 0xb4d   :  { %s3025_s0 = sshll.u32 %s3407_s15, 4  ;;  %s3026_s0 = int_to_ptr.vmem [resolvable:$true] %s3025_s0 }
 0xb4e   :  { %v2805_v37 = vmul.f32 %v2803_v36, %v2786_v24 }
 0xb50   :  { %3237 = vmatmul.msk.f32.gmra.mxu2 %vm1401_vm9, %v2805_v37 }
 0xbcb   :  { %v2839_v39 = vpop.f32.mrf.mxu2 }
 0xbcc   :  { %v2840_v40 = vadd.f32 %v2839_v39, %v2815_v38 }
 0xbce   :  { %v2845_v41 = vadd.f32 %v2840_v40, %v2747_v1 }
 0xbd0   :  { %v2847_v42 = vsel %vm83_vm0, %v2845_v41, 0.0 }
 0xbd1   :  { %2848 = vadd.xlane.f32.xlu0 %v2847_v42 }
 0xbd3   :  { %v2842_v44 = vpop.f32.mrf.mxu2 }
 0xbd4   :  { %v2843_v45 = vadd.f32 %v2842_v44, %v2815_v38 }
 0xbd6   :  { %v2846_v46 = vadd.f32 %v2843_v45, %v2748_v6 }
 0xbd8   :  { %v2850_v47 = vsel %vm83_vm0, %v2846_v46, 0.0 }
 0xbd9   :  { %2851 = vadd.xlane.f32.xlu2 %v2850_v47 }
 0xc44   :  { %v2849_v48 = vpop.xlane.xlu0 %2848 }
 0xc45   :  { %v2853_v49 = vmul.f32 %v2849_v48, %v3789_v19  ;;  %v2999_v48 = vld [vmem:[%s4286_s3] sm:$0x3]  ;;  %s3408_s3 = smov [#allocation4]  }
 0xc46   :  { %s3036_s10 = sshll.u32 %s3408_s3, 4  ;;  %s3037_s10 = int_to_ptr.vmem [resolvable:$true] %s3036_s10 }
 0xc47   :  { %v2855_v50 = vsub.f32 %v2845_v41, %v2853_v49 }
 0xc49   :  { %v2857_v51 = vmul.f32 %v2855_v50, %v2855_v50 }
 0xc4b   :  { %v2859_v53 = vsel %vm83_vm0, %v2857_v51, 0.0 }
 0xc4c   :  { %2860 = vadd.xlane.f32.xlu2 %v2859_v53  ;;  %v2852_v54 = vpop.xlane.xlu2 %2851 }
 0xc4d   :  { %v2854_v55 = vmul.f32 %v2852_v54, %v3789_v19 }
 0xc4f   :  { %v2856_v56 = vsub.f32 %v2846_v46, %v2854_v55 }
 0xc51   :  { %v2858_v57 = vmul.f32 %v2856_v56, %v2856_v56 }
 0xc53   :  { %v2862_v58 = vsel %vm83_vm0, %v2858_v57, 0.0 }
 0xc54   :  { %2863 = vadd.xlane.f32.xlu1 %v2862_v58 }
 0xcbf   :  { %v2861_v59 = vpop.xlane.xlu2 %2860 }
 0xcc0   :  { %v2865_v60 = vmul.f32 %v2861_v59, %v3789_v19 }
 0xcc2   :  { %v2867_v61 = vadd.f32 1e-12, %v2865_v60 }
 0xcc4   :  { %3336 = vrsqrt.f32 %v2867_v61  ;;  %vm2875_vm8 = vweird.f32 %v2867_v61 }
 0xcc7   :  { %v2864_v62 = vpop.xlane.xlu1 %2863 }
 0xcc8   :  { %v2866_v1 = vmul.f32 %v2864_v62, %v3789_v19 }
 0xcca   :  { %v3337_v3 = vpop.eup %3336  ;;  %v2868_v4 = vadd.f32 1e-12, %v2866_v1 }
 0xccb   :  { %v2870_v5 = vmul.f32 %v3337_v3, %v2867_v61  ;;  %vm2876_vm7 = vweird.f32 %v3337_v3 }
 0xccc   :  { %3338 = vrsqrt.f32 %v2868_v4  ;;  %vm2877_vm9 = vmor %vm2875_vm8, %vm2876_vm7  ;;  %vm2885_vm11 = vweird.f32 %v2868_v4 }
 0xccd   :  { %v2871_v6 = vmul.f32 %v3337_v3, %v2870_v5 }
 0xccf   :  { %v2872_v7 = vmul.f32 0.5, %v2871_v6 }
 0xcd1   :  { %v2873_v8 = vsub.f32 1.5, %v2872_v7 }
 0xcd2   :  { %v3339_v9 = vpop.eup %3338 }
 0xcd3   :  { %v2880_v10 = vmul.f32 %v3339_v9, %v2868_v4  ;;  %v2874_v11 = vmul.f32 %v3337_v3, %v2873_v8  ;;  %vm2886_vm10 = vweird.f32 %v3339_v9 }
 0xcd4   :  { %vm2887_vm12 = vmor %vm2885_vm11, %vm2886_vm10 }
 0xcd5   :  { %v2881_v12 = vmul.f32 %v3339_v9, %v2880_v10  ;;  %v2878_v14 = vsel %vm2877_vm9, %v3337_v3, %v2874_v11 }
 0xcd6   :  { %v2889_v18 = vmul.f32 %v2878_v14, %v2855_v50 }
 0xcd7   :  { %v2882_v19 = vmul.f32 0.5, %v2881_v12 }
 0xcd8   :  { %v2892_v17 = vmul.f32 %v2891_v16, %v2889_v18 }
 0xcd9   :  { %v2883_v15 = vsub.f32 1.5, %v2882_v19 }
 0xcda   :  { %v2895_v25 = vadd.f32 %v2894_v23, %v2892_v17 }
 0xcdb   :  { %v2884_v13 = vmul.f32 %v3339_v9, %v2883_v15 }
 0xcdd   :  { %v2888_v20 = vsel %vm2887_vm12, %v3339_v9, %v2884_v13 }
 0xcde   :  { %v2890_v21 = vmul.f32 %v2888_v20, %v2856_v56 }
 0xce0   :  { %v2893_v22 = vmul.f32 %v2891_v16, %v2890_v21 }
 0xce2   :  { %v2896_v24 = vadd.f32 %v2894_v23, %v2893_v22 }
 0xce4   :  { %2916 = vmatpush.msrb.mxu3 %v2896_v24 }
 0xce6   :  { %2917 = vmatpush.msrb.mxu3 %v2895_v25 }
 0xce7   :  { %3238 = vmatmul.msk.f32.vlgmr.msrb.gmra.mxu3 %vm2898_vm13, %v2897_v26 }
 0xce8   :  { %2977 = vmatpush.msra.mxu3 %v2957_v52 }
 0xcea   :  { %2978 = vmatpush.msra.mxu3 %v2956_v30 }
 0xcec   :  { %2979 = vmatpush.msra.mxu3 %v2955_v43 }
 0xcee   :  { %2980 = vmatpush.msra.mxu3 %v2954_v31 }
 0xd6a   :  { %v2919_v29 = vpop.f32.mrf.mxu3 }
 0xd6b   :  { %3239 = vmatmul.msk.f32.vlgmr.msrb.gmra.mxu0 %vm83_vm0, %v2919_v29 }
 0xde8   :  { %v2950_v32 = vpop.f32.mrf.mxu0 }
 0xde9   :  { %v2951_v33 = vadd.f32 %v3248_v28, %v2950_v32 }
 0xdeb   :  { %3340 = vtanh.f32 %v2951_v33 }
 0xdf1   :  { %v3341_v34 = vpop.eup %3340 }
 0xdf2   :  { %3240 = vmatmul.msk.f32.vlgmr.msra.gmra.mxu3 %vm83_vm0, %v3341_v34  ;;  %vm3005_vm0 = vcmask 1024  }
 0xe75   :  { %v2982_v36 = vpop.f32.mrf.mxu3 }
 0xe76   :  { %v2983_v37 = vadd.f32 %v3249_v35, %v2982_v36 }
 0xe78   :  { %v2987_v38 = vsel %vm2985_vm14, %v2983_v37, -inf  ;;  %2986 = vst.msk [vmem:[#allocation2] sm:$0x3] %vm2985_vm14, %v2983_v37 }
 0xe79   :  { %2988 = vmax.xlane.f32.xlu0 %v2987_v38  ;;  %3030 = dma.vmem_to_hbm [thread:$0]  %s3026_s0, 32, %s3028_s9, [#allocation3]  }
 0xeec   :  { %v2989_v39 = vpop.xlane.xlu0 %2988 }
 0xeed   :  { %v2990_v40 = vsub.f32 %v2983_v37, %v2989_v39 }
 0xeef   :  { %v2991_v41 = vmul.f32 1.442695, %v2990_v40 }
 0xef1   :  { %3342 = vpow2.f32 %v2991_v41 }
 0xef7   :  { %v3343_v42 = vpop.eup %3342 }
 0xef8   :  { %v2993_v44 = vsel %vm2985_vm14, %v3343_v42, 0.0 }
 0xef9   :  { %2994 = vadd.xlane.f32.xlu1 %v2993_v44 }
 0xf6c   :  { %v2995_v45 = vpop.xlane.xlu1 %2994 }
 0xf6d   :  { %3344 = vlog2.f32 %v2995_v45 }
 0xf73   :  { %v3345_v46 = vpop.eup %3344 }
 0xf74   :  { %v2997_v47 = vmul.f32 0.6931472, %v3345_v46 }
 0xf76   :  { %v2998_v49 = vsub.f32 %v2990_v40, %v2997_v47 }
 0xf78   :  { %v3000_v50 = vmul.f32 %v2999_v48, %v2998_v49 }
 0xf7a   :  { %v3001_v51 = vsel %vm2985_vm14, %v3000_v50, 0.0 }
 0xf7b   :  { %3002 = vadd.xlane.f32.xlu2 %v3001_v51 }
 0xfee   :  { %v3003_v53 = vpop.xlane.xlu2 %3002 }
 0xfef   :  { %v3004_v54 = vsub.f32 0.0, %v3003_v53 }
 0xff1   :  { %v3006_v55 = vsel %vm3005_vm0, %v3004_v54, 0.0 }
 0xff2   :  { %3007 = vadd.xlane.f32.xlu0 %v3006_v55 }
0x1065   :  { %v3008_v56 = vpop.xlane.xlu0 %3007 }
0x1066   :  { %v3009_v57 = vrot.slane %v3008_v56, 4 }
0x1068   :  { %v3010_v58 = vadd.f32 %v3009_v57, %v3008_v56 }
0x106a   :  { %v3011_v59 = vrot.slane %v3010_v58, 2 }
0x106c   :  { %v3012_v60 = vadd.f32 %v3011_v59, %v3010_v58 }
0x106e   :  { %v3013_v61 = vrot.slane %v3012_v60, 1 }
0x1070   :  { %v3014_v62 = vadd.f32 %v3013_v61, %v3012_v60 }
0x1072   :  { %3241 = vpush %v3014_v62 }
0x10a3   :  { %s3242_s8 = spop %3241 }
0x10a4   :  { %v3016_v63 = vstv %s3242_s8 }
0x10a5   :  { %v3017_v0 = vmul.f32 0.5, %v3016_v63 }
0x10a7   :  { %3019 = vst.msk [vmem:[#allocation4] sm:$0x1] %vm3018_vm15, %v3017_v0 }
0x10a8   :  { %3041 = dma.vmem_to_hbm [thread:$0]  %s3037_s10, 16, %s3039_s1, [#allocation5]  }
0x10a9   :  { %3402 = dma.done.wait [#allocation3], 32  }
0x10aa   :  { %3403 = vsyncadd [#allocation3], 4294967264 }
0x10ab   :  { %3404 = dma.done.wait [#allocation5], 16  }
0x10ac   :  { %3405 = vsyncadd [#allocation5], 4294967280 }
0x10ad   :  { %3050 = vsyncpa [#allocation3], 1 }
0x10ae   :  { %3051 = vsyncpa [#allocation5], 1 }

</bundles_post_ra>
